<compile_context>
chip_gen: v7x
topology: tpu7x:2x2x1
jax: 0.10.0
libtpu: 0.0.40
codegen_flags: <defaults>
</compile_context>

<pallas_src>
import math

import jax
import jax.numpy as jnp
import numpy as np
from jax.experimental import pallas as pl
from jax.experimental.pallas import tpu as pltpu


_INV_SQRT2 = 1.0 / math.sqrt(2.0)


def _mlp_fused_kernel(x_ref, w1_ref, b1_ref, w2_ref, b2_ref, o_ref, acc_ref):
    """One (row-tile, hidden-chunk) step of fused fc1 -> exact GELU -> fc2.

    MXU operands are bf16 (pre-cast in the wrapper); accumulation and the
    element-wise bias/GELU math are f32.  The hidden activation chunk lives
    only in VMEM/vregs and never touches HBM.
    """
    h_idx = pl.program_id(1)

    @pl.when(h_idx == 0)
    def _():
        acc_ref[...] = jnp.zeros_like(acc_ref)

    # fc1 for this hidden chunk (bf16 x bf16 -> f32 acc).
    h = jnp.dot(x_ref[...], w1_ref[...], preferred_element_type=jnp.float32)
    h = h + b1_ref[...]
    # Exact (erf-form) GELU in f32 -- matches torch.nn.GELU() default and is
    # safe on v5e (no bf16 VPU/EUP).  TODO(synk): optionally bf16/tanh GELU on
    # v6e/v7x if profiling shows the VALU slot binding.
    h = 0.5 * h * (1.0 + jax.lax.erf(h * _INV_SQRT2))

    # fc2 partial product accumulated across hidden chunks.
    acc_ref[...] += jnp.dot(h.astype(jnp.bfloat16), w2_ref[...],
                            preferred_element_type=jnp.float32)

    @pl.when(h_idx == pl.num_programs(1) - 1)
    def _():
        o_ref[...] = (acc_ref[...] + b2_ref[...]).astype(o_ref.dtype)


def _vmem_limit_bytes():
    """Generation-aware VMEM limit: ~3/4 of physical, capped at 100 MiB."""
    try:
        cap = pltpu.get_tpu_info().vmem_capacity_bytes
    except Exception:
        cap = 128 * 1024 * 1024
    return int(min(cap * 3 // 4, 100 * 1024 * 1024))


def _pick_hidden_tile(hidden, req):
    """Largest multiple of 128 <= req that divides `hidden`, else full hidden."""
    if hidden <= req or hidden % 128 != 0:
        # TODO(synk): non-128-multiple hidden keeps full weights resident;
        # fine at small sizes, revisit if hidden gets large and odd-shaped.
        return hidden
    t = (req // 128) * 128
    while t >= 128:
        if hidden % t == 0:
            return t
        t -= 128
    return hidden


def _select_tiles(M, d_in, hidden, d_out, vmem_limit, tile_m_req, tile_h_req):
    tile_h = _pick_hidden_tile(hidden, tile_h_req)

    # Row tile: multiple of 8 sublanes, no larger than (padded) M.
    tile_m = min(tile_m_req, ((M + 7) // 8) * 8)
    tile_m = max(8, (tile_m // 8) * 8)
    # Keep >= 2 row tiles so both v7x TensorCores get work ("parallel" axis).
    if M >= 16:
        cap = ((((M + 1) // 2) + 7) // 8) * 8
        tile_m = min(tile_m, cap)

    def vmem_est(tm, th):
        bf2, f4 = 2, 4
        x_tiles = 2 * tm * d_in * bf2          # double-buffered bf16 input tile
        w1_tiles = 2 * d_in * th * bf2         # double-buffered bf16 fc1 chunk
        w2_tiles = 2 * th * d_out * bf2        # double-buffered bf16 fc2 chunk
        b_tiles = 2 * (th + d_out) * f4        # biases
        out_tiles = 2 * tm * d_out * f4        # double-buffered output tile
        acc = tm * d_out * f4                  # f32 accumulator scratch
        hid = tm * th * f4                     # f32 hidden activation chunk
        return x_tiles + w1_tiles + w2_tiles + b_tiles + out_tiles + acc + hid

    budget = int(vmem_limit * 0.7)
    while vmem_est(tile_m, tile_h) > budget and tile_m > 8:
        tile_m = max(8, (tile_m // 2 // 8) * 8)
    while (vmem_est(tile_m, tile_h) > budget and hidden % 128 == 0
           and tile_h > 128 and (hidden % max(128, tile_h // 2)) == 0):
        tile_h = max(128, tile_h // 2)
    return tile_m, tile_h


def mlp_forward(x, w1, b1, w2, b2, *, tile_m=512, tile_h=512):
    """y = fc2(gelu(fc1(x)));  dropout p=0.0 -> identity."""
    orig_shape = x.shape
    d_in = orig_shape[-1]
    hidden = w1.shape[1]
    d_out = w2.shape[1]
    assert w1.shape == (d_in, hidden) and w2.shape == (hidden, d_out)
    assert b1.shape == (1, hidden) and b2.shape == (1, d_out)

    xm = x.reshape(-1, d_in)
    M = xm.shape[0]

    vmem_limit = _vmem_limit_bytes()
    tm, th = _select_tiles(M, d_in, hidden, d_out, vmem_limit, tile_m, tile_h)
    grid_m = pl.cdiv(M, tm)           # non-divisible last block handled by Pallas
    grid_h = hidden // th             # th divides hidden by construction

    # Pre-cast MXU operands to bf16 once; biases stay f32 for exact adds.
    xm_bf = xm.astype(jnp.bfloat16)
    w1_bf = w1.astype(jnp.bfloat16)
    w2_bf = w2.astype(jnp.bfloat16)
    b1_f = b1.astype(jnp.float32)
    b2_f = b2.astype(jnp.float32)

    out_itemsize = jnp.dtype(x.dtype).itemsize
    cost = pl.CostEstimate(
        flops=2 * M * (d_in * hidden + hidden * d_out),
        transcendentals=M * hidden,
        bytes_accessed=(xm_bf.size * 2 + w1_bf.size * 2 + w2_bf.size * 2
                        + b1_f.size * 4 + b2_f.size * 4 + M * d_out * out_itemsize),
    )

    out = pl.pallas_call(
        _mlp_fused_kernel,
        out_shape=jax.ShapeDtypeStruct((M, d_out), x.dtype),
        grid=(grid_m, grid_h),
        in_specs=[
            pl.BlockSpec((tm, d_in), lambda i, h: (i, 0)),      # x row-tile
            pl.BlockSpec((d_in, th), lambda i, h: (0, h)),      # fc1 weight chunk
            pl.BlockSpec((1, th), lambda i, h: (0, h)),         # fc1 bias chunk
            pl.BlockSpec((th, d_out), lambda i, h: (h, 0)),     # fc2 weight chunk
            pl.BlockSpec((1, d_out), lambda i, h: (0, 0)),      # fc2 bias
        ],
        out_specs=pl.BlockSpec((tm, d_out), lambda i, h: (i, 0)),
        scratch_shapes=[pltpu.VMEM((tm, d_out), jnp.float32)],
        compiler_params=pltpu.CompilerParams(
            dimension_semantics=("parallel", "arbitrary"),
            vmem_limit_bytes=vmem_limit,
        ),
        cost_estimate=cost,
    )(xm_bf, w1_bf, b1_f, w2_bf, b2_f)

    return out.reshape(*orig_shape[:-1], d_out)


# ---------------- reference (pure JAX, f32) & deterministic init ----------------

def _mlp_reference(x, w1, b1, w2, b2):
    h = x @ w1 + b1
    h = 0.5 * h * (1.0 + jax.lax.erf(h * _INV_SQRT2))
    return h @ w2 + b2


def init_params(key, d_in, hidden, d_out):
    # Mimic nn.Linear default init: U(-1/sqrt(fan_in), 1/sqrt(fan_in)).
    k1, k2, k3, k4 = jax.random.split(key, 4)
    lim1 = 1.0 / math.sqrt(d_in)
    lim2 = 1.0 / math.sqrt(hidden)
    w1 = jax.random.uniform(k1, (d_in, hidden), jnp.float32, -lim1, lim1)
    b1 = jax.random.uniform(k2, (1, hidden), jnp.float32, -lim1, lim1)
    w2 = jax.random.uniform(k3, (hidden, d_out), jnp.float32, -lim2, lim2)
    b2 = jax.random.uniform(k4, (1, d_out), jnp.float32, -lim2, lim2)
    return w1, b1, w2, b2


if __name__ == "__main__":
    # Small, lane-dense shapes: (B, N, C) tokens with C=128, hidden=4*C=512.
    B, N, d_in = 2, 128, 128
    hidden = 4 * d_in          # mlp_ratio = 4
    d_out = d_in               # out_features defaults to in_features

    key = jax.random.PRNGKey(0)
    kx, kp = jax.random.split(key)
    x = jax.random.normal(kx, (B, N, d_in), jnp.float32)
    w1, b1, w2, b2 = init_params(kp, d_in, hidden, d_out)

    fwd = jax.jit(mlp_forward)
    out = fwd(x, w1, b1, w2, b2)
    jax.block_until_ready(out)

    assert out.shape == (B, N, d_out), out.shape
    assert bool(jnp.all(jnp.isfinite(out)))

    ref = _mlp_reference(x, w1, b1, w2, b2)
    np.testing.assert_allclose(np.asarray(out), np.asarray(ref), rtol=3e-2, atol=3e-2)

    print("KERNEL_OK")
</pallas_src>

<mosaic_0001>
module attributes {stable_mosaic.version = 11 : i64} {
  func.func @_mlp_fused_kernel(%arg0: i32, %arg1: i32, %arg2: memref<128x128xbf16, #tpu.memory_space<vmem>>, %arg3: memref<128x512xbf16, #tpu.memory_space<vmem>>, %arg4: memref<1x512xf32, #tpu.memory_space<vmem>>, %arg5: memref<512x128xbf16, #tpu.memory_space<vmem>>, %arg6: memref<1x128xf32, #tpu.memory_space<vmem>>, %arg7: memref<128x128xf32, #tpu.memory_space<vmem>>, %arg8: memref<128x128xf32, #tpu.memory_space<vmem>>) attributes {dimension_semantics = [#tpu.dimension_semantics<parallel>, #tpu.dimension_semantics<arbitrary>], iteration_bounds = array<i64: 2, 1>, scalar_prefetch = 0 : i64, scratch_operands = 1 : i64, tpu.core_type = #tpu.core_type<tc>, window_params = [{transform_indices = @transform_0, window_bounds = array<i64: 128, 128>}, {transform_indices = @transform_1, window_bounds = array<i64: 128, 512>}, {transform_indices = @transform_2, window_bounds = array<i64: 1, 512>}, {transform_indices = @transform_3, window_bounds = array<i64: 512, 128>}, {pipeline_mode = #tpu.pipeline_mode<synchronous>, transform_indices = @transform_4, window_bounds = array<i64: 1, 128>}, {transform_indices = @transform_5, window_bounds = array<i64: 128, 128>}]} {
    %c0_i32 = arith.constant 0 : i32
    %0 = arith.cmpi eq, %arg1, %c0_i32 : i32
    %1 = arith.extui %0 : i1 to i32
    %c0_i32_0 = arith.constant 0 : i32
    %2 = arith.cmpi ne, %1, %c0_i32_0 : i32
    scf.if %2 {
      %cst_18 = arith.constant 0.000000e+00 : f32
      %26 = vector.broadcast %cst_18 : f32 to vector<128x128xf32>
      %c0_19 = arith.constant 0 : index
      %c0_20 = arith.constant 0 : index
      %27 = vector.load %arg8[%c0_19, %c0_20] : memref<128x128xf32, #tpu.memory_space<vmem>>, vector<128x128xf32>
      tpu.vector_store %arg8[%c0_19, %c0_20], %26 {strides = array<i32>} : memref<128x128xf32, #tpu.memory_space<vmem>>, vector<128x128xf32>,
    } else {
    }
    %c0 = arith.constant 0 : index
    %c0_1 = arith.constant 0 : index
    %3 = vector.load %arg2[%c0, %c0_1] : memref<128x128xbf16, #tpu.memory_space<vmem>>, vector<128x128xbf16>
    %c0_2 = arith.constant 0 : index
    %c0_3 = arith.constant 0 : index
    %4 = vector.load %arg3[%c0_2, %c0_3] : memref<128x512xbf16, #tpu.memory_space<vmem>>, vector<128x512xbf16>
    %cst = arith.constant dense<0.000000e+00> : vector<128x512xf32>
    %5 = tpu.matmul %3, %4, %cst {dimension_numbers = #tpu.dot_dimension_numbers<[1], [0], [0], [1], [0, 0, 1, 1], [], []>} : vector<128x128xbf16>, vector<128x512xbf16>, vector<128x512xf32> -> vector<128x512xf32>
    %c0_4 = arith.constant 0 : index
    %c0_5 = arith.constant 0 : index
    %6 = vector.load %arg4[%c0_4, %c0_5] : memref<1x512xf32, #tpu.memory_space<vmem>>, vector<1x512xf32>
    %7 = vector.broadcast %6 : vector<1x512xf32> to vector<128x512xf32>
    %8 = arith.addf %5, %7 : vector<128x512xf32>
    %cst_6 = arith.constant 5.000000e-01 : f32
    %9 = vector.broadcast %cst_6 : f32 to vector<128x512xf32>
    %10 = arith.mulf %9, %8 : vector<128x512xf32>
    %cst_7 = arith.constant 0.707106769 : f32
    %11 = vector.broadcast %cst_7 : f32 to vector<128x512xf32>
    %12 = arith.mulf %8, %11 : vector<128x512xf32>
    %13 = math.erf %12 : vector<128x512xf32>
    %cst_8 = arith.constant 1.000000e+00 : f32
    %14 = vector.broadcast %cst_8 : f32 to vector<128x512xf32>
    %15 = arith.addf %14, %13 : vector<128x512xf32>
    %16 = arith.mulf %10, %15 : vector<128x512xf32>
    %c0_9 = arith.constant 0 : index
    %c0_10 = arith.constant 0 : index
    %17 = vector.load %arg8[%c0_9, %c0_10] : memref<128x128xf32, #tpu.memory_space<vmem>>, vector<128x128xf32>
    %18 = arith.truncf %16 : vector<128x512xf32> to vector<128x512xbf16>
    %c0_11 = arith.constant 0 : index
    %c0_12 = arith.constant 0 : index
    %19 = vector.load %arg5[%c0_11, %c0_12] : memref<512x128xbf16, #tpu.memory_space<vmem>>, vector<512x128xbf16>
    %cst_13 = arith.constant dense<0.000000e+00> : vector<128x128xf32>
    %20 = tpu.matmul %18, %19, %cst_13 {dimension_numbers = #tpu.dot_dimension_numbers<[1], [0], [0], [1], [0, 0, 1, 1], [], []>} : vector<128x512xbf16>, vector<512x128xbf16>, vector<128x128xf32> -> vector<128x128xf32>
    %21 = arith.addf %17, %20 : vector<128x128xf32>
    %c0_14 = arith.constant 0 : index
    %c0_15 = arith.constant 0 : index
    %22 = vector.load %arg8[%c0_14, %c0_15] : memref<128x128xf32, #tpu.memory_space<vmem>>, vector<128x128xf32>
    tpu.vector_store %arg8[%c0_14, %c0_15], %21 {strides = array<i32>} : memref<128x128xf32, #tpu.memory_space<vmem>>, vector<128x128xf32>,
    %c0_i32_16 = arith.constant 0 : i32
    %23 = arith.cmpi eq, %arg1, %c0_i32_16 : i32
    %24 = arith.extui %23 : i1 to i32
    %c0_i32_17 = arith.constant 0 : i32
    %25 = arith.cmpi ne, %24, %c0_i32_17 : i32
    scf.if %25 {
      %c0_18 = arith.constant 0 : index
      %c0_19 = arith.constant 0 : index
      %26 = vector.load %arg8[%c0_18, %c0_19] : memref<128x128xf32, #tpu.memory_space<vmem>>, vector<128x128xf32>
      %c0_20 = arith.constant 0 : index
      %c0_21 = arith.constant 0 : index
      %27 = vector.load %arg6[%c0_20, %c0_21] : memref<1x128xf32, #tpu.memory_space<vmem>>, vector<1x128xf32>
      %28 = vector.broadcast %27 : vector<1x128xf32> to vector<128x128xf32>
      %29 = arith.addf %26, %28 : vector<128x128xf32>
      %c0_22 = arith.constant 0 : index
      %c0_23 = arith.constant 0 : index
      %30 = vector.load %arg7[%c0_22, %c0_23] : memref<128x128xf32, #tpu.memory_space<vmem>>, vector<128x128xf32>
      tpu.vector_store %arg7[%c0_22, %c0_23], %29 {strides = array<i32>} : memref<128x128xf32, #tpu.memory_space<vmem>>, vector<128x128xf32>,
    } else {
    }
    return
  }
  func.func @transform_0(%arg0: i32, %arg1: i32) -> (i32, i32) {
    %c0_i32 = arith.constant 0 : i32
    %c0_i32_0 = arith.constant 0 : i32
    return %arg0, %c0_i32 : i32, i32
  }
  func.func @transform_1(%arg0: i32, %arg1: i32) -> (i32, i32) {
    %c0_i32 = arith.constant 0 : i32
    %c0_i32_0 = arith.constant 0 : i32
    return %c0_i32, %arg1 : i32, i32
  }
  func.func @transform_2(%arg0: i32, %arg1: i32) -> (i32, i32) {
    %c0_i32 = arith.constant 0 : i32
    %c0_i32_0 = arith.constant 0 : i32
    return %c0_i32, %arg1 : i32, i32
  }
  func.func @transform_3(%arg0: i32, %arg1: i32) -> (i32, i32) {
    %c0_i32 = arith.constant 0 : i32
    %c0_i32_0 = arith.constant 0 : i32
    return %arg1, %c0_i32 : i32, i32
  }
  func.func @transform_4(%arg0: i32, %arg1: i32) -> (i32, i32) {
    %c0_i32 = arith.constant 0 : i32
    %c0_i32_0 = arith.constant 0 : i32
    %c0_i32_1 = arith.constant 0 : i32
    return %c0_i32, %c0_i32_0 : i32, i32
  }
  func.func @transform_5(%arg0: i32, %arg1: i32) -> (i32, i32) {
    %c0_i32 = arith.constant 0 : i32
    %c0_i32_0 = arith.constant 0 : i32
    return %arg0, %c0_i32 : i32, i32
  }
}

</mosaic_0001>

<bundles_post_ra>
// kernel: mlp_forward.1
= control target key start
LH: loop header
LB: loop body
LE: loop exit
PB: predicated region body
PF: predicated region fallthrough
CT: control target
= control target key end

     0   :  { %s3606_s0 = inlined_call_operand.hbm [shape: bf16[256,128], index: 0, kind: input, shape index: {}]   ;;  %s3607_s1 = inlined_call_operand.hbm [shape: bf16[128,512], index: 1, kind: input, shape index: {}]   ;;  %s3608_s2 = inlined_call_operand.hbm [shape: f32[1,512], index: 2, kind: input, shape index: {}]   ;;  %s3609_s3 = inlined_call_operand.hbm [shape: bf16[512,128], index: 3, kind: input, shape index: {}]   ;;  %s3610_s4 = inlined_call_operand.hbm [shape: f32[1,128], index: 4, kind: input, shape index: {}]   ;;  %s3611_s5 = inlined_call_operand.hbm [shape: f32[256,128], index: 5, kind: output, shape index: {}]  }
   0x1   :  { %3617 = sst [smem:[#allocation23_spill]] %s3607_s1 }
   0x2   :  { %10 = vsyncpa [#allocation4], 0 }
   0x3   :  { %12 = vsyncpa [#allocation4 + $0x1], 0 }
   0x4   :  { %13 = vsyncpa [#allocation7], 0 }
   0x5   :  { %14 = vsyncpa [#allocation10], 0 }
   0x6   :  { %15 = vsyncpa [#allocation5], 0 }
   0x7   :  { %17 = vsyncpa [#allocation5 + $0x1], 0  ;;  %s2739_s18 = smov 0   ;;  %s2741_s19 = smov 0  }
   0x8   :  { %s2743_s20 = smov 0   ;;  %s2745_s21 = smov 0  }
   0x9   :  { %s2747_s22 = smov 0   ;;  %s2749_s23 = smov 0  }
   0xa LB: > { %s1910_s24 = sadd.s32 4294967295, %s2694_s23   ;;  %s1911_s25 = sadd.s32 4294967294, %s2694_s23   ;;  %s2694_s23 = sphi %s2749_s23, %s23_s23   ;;  %s2690_s22 = sphi %s2747_s22, %s3650_s22   ;;  %s2686_s21 = sphi %s2745_s21, %s3649_s21   ;;  %s2682_s20 = sphi %s2743_s20, %s3648_s20   ;;  %s2678_s19 = sphi %s2741_s19, %s3647_s19   ;;  %s2674_s18 = sphi %s2739_s18, %s3646_s18  }
   0xb   : > { %p55_p0 = scmp.ne.s32.totalorder %s2678_s19, %s2674_s18  ;;  %p2773_p1 = scmp.eq.s32.totalorder %s1910_s24, 0 }
   0xc   : > { %p2777_p2 = scmp.eq.s32.totalorder %s1910_s24, 1  ;;  %p184_p3 = scmp.eq.s32.totalorder %s1911_s25, 1 }
   0xd   : > { %s3618_s26 = scalar_select %p2773_p1, 1, 0 }
   0xe   : > { %s3619_s27 = scalar_select %p2777_p2, 1, 0 }
   0xf   : > { %p2783_p4 = por %p2773_p1, %p55_p0  ;;  %p1912_p5 = scmp.ge.s32.totalorder %s2694_s23, 1 }
  0x10   : > { %p2788_p6 = por %p184_p3, %p55_p0  ;;  %p191_p7 = scmp.lt.s32.totalorder %s2694_s23, 3 }
  0x11   : > { %s3620_s28 = scalar_select %p2783_p4, 1, 0 }
  0x12   : > { %s3621_s29 = scalar_select %p2788_p6, 1, 0 }
  0x13   : > { %p2793_p8 = pnand %p1912_p5, %p191_p7  ;;  %s2696_s6 = smov [#allocation6]  }
  0x14   : > { %3622 = sst [smem:[#allocation17_spill]] %s3621_s29  ;;  %s206_s7 = sshll.u32 %s2696_s6, 4  ;;  %s2797_s7 = int_to_ptr.vmem [resolvable:$true] %s206_s7 }
  0x15   : > { %s3623_s30 = scalar_select %p2793_p8, 1, 0 }
  0x16   : > { %p2156_p9 = pneg %p2793_p8  ;;  %s2697_s9 = smov [#allocation9]  }
  0x17   : > { %s236_s10 = sshll.u32 %s2697_s9, 4  ;;  %s3625_s1 = sld [smem:[#allocation23_spill]]  ;;  %s2808_s10 = int_to_ptr.vmem [resolvable:$true] %s236_s10 }
  0x18   : > { %p2804_p11 = pnand %p2156_p9, %p2773_p1 }
  0x1a   : > { %p2818_p13 = pneg %p2804_p11 }
  0x1d   : > { %s2462_s13 = scalar_lea.hbm %s3625_s1, 4096 }
  0x1e   : > { %p2463_p12 = scmp.ne.s32.totalorder %s3625_s1, %s2462_s13  ;;  %p2469_p5 = scmp.lt.u32.totalorder %s2462_s13, %s3625_s1 }
  0x20   : > { %p2465_p0 = pnand %p2818_p13, %p2463_p12 }
  0x22   : > { %p2466_p3 = pneg %p2465_p0 }
  0x24   : > { %p2471_p7 = pnand %p2469_p5, %p2466_p3 }
  0x26   : > { %2474 = shalt.err (!%p2471_p7)
}
  0x27   : > { %s2475_s25 = scalar_lea.vmem %s2797_s7, 4096  ;;  %p2483_p1 = scmp.lt.s32.totalorder %s2797_s7, %s2797_s7 }
  0x28   : > { %p2476_p9 = scmp.ne.s32.totalorder %s2797_s7, %s2475_s25  ;;  %p2484_p4 = scmp.lt.s32.totalorder %s2475_s25, %s2475_s25 }
  0x2a   : > { %p2478_p10 = pnand %p2476_p9, %p2818_p13  ;;  %p2485_p12 = por %p2484_p4, %p2483_p1 }
  0x2c   : > { %p2479_p6 = pneg %p2478_p10 }
  0x2e   : > { %p2486_p0 = pnand %p2485_p12, %p2479_p6 }
  0x30   : > { %2489 = shalt.err (!%p2486_p0)
}
  0x31   : > { %s2698_s6 = smov 256   ;;  %s2699_s9 = smov 16  }
  0x32   : > { %2159 = dma.hbm_to_vmem [thread:$0]  (!%p2804_p11), %s3625_s1, 4096, %s2797_s7, [#allocation7], %s2698_s6, %s2698_s6, %s2699_s9  }
  0x33   : > { %s2490_s15 = scalar_lea.hbm %s3609_s3, 4096 }
  0x34   : > { %p2491_p1 = scmp.ne.s32.totalorder %s3609_s3, %s2490_s15  ;;  %p2497_p10 = scmp.lt.u32.totalorder %s2490_s15, %s3609_s3 }
  0x36   : > { %p2493_p4 = pnand %p2491_p1, %p2818_p13 }
  0x38   : > { %p2494_p6 = pneg %p2493_p4 }
  0x3a   : > { %p2499_p3 = pnand %p2497_p10, %p2494_p6 }
  0x3c   : > { %2502 = shalt.err (!%p2499_p3)
}
  0x3d   : > { %s2503_s7 = scalar_lea.vmem %s2808_s10, 4096  ;;  %p2511_p12 = scmp.lt.s32.totalorder %s2808_s10, %s2808_s10 }
  0x3e   : > { %p2504_p5 = scmp.ne.s32.totalorder %s2808_s10, %s2503_s7  ;;  %p2512_p0 = scmp.lt.s32.totalorder %s2503_s7, %s2503_s7 }
  0x40   : > { %p2506_p7 = pnand %p2504_p5, %p2818_p13  ;;  %p2513_p1 = por %p2512_p0, %p2511_p12 }
  0x42   : > { %p2507_p9 = pneg %p2506_p7 }
  0x44   : > { %p2514_p4 = pnand %p2513_p1, %p2507_p9 }
  0x46   : > { %2517 = shalt.err (!%p2514_p4)
}
  0x47   : > { %s2700_s6 = smov 64   ;;  %s2701_s29 = smov 4  }
  0x48   : > { %2165 = dma.hbm_to_vmem [thread:$0]  (!%p2804_p11), %s3609_s3, 4096, %s2808_s10, [#allocation10], %s2700_s6, %s2700_s6, %s2701_s29  }
  0x49   : > { %s2702_s12 = smov [#allocation8]   ;;  %s2703_s14 = smov [#allocation11]  }
  0x4a   : > { %s223_s13 = sshll.u32 %s2702_s12, 4  ;;  %s250_s15 = sshll.u32 %s2703_s14, 4  ;;  %s224_s13 = int_to_ptr.vmem [resolvable:$true] %s223_s13  ;;  %s2865_s15 = int_to_ptr.vmem [resolvable:$true] %s250_s15 }
  0x4b   : > { %s2518_s25 = scalar_lea.hbm %s3608_s2, 64 }
  0x4c   : > { %p2519_p6 = scmp.ne.s32.totalorder %s3608_s2, %s2518_s25  ;;  %p2525_p5 = scmp.lt.u32.totalorder %s2518_s25, %s3608_s2 }
  0x4e   : > { %p2521_p10 = pnand %p2519_p6, %p2818_p13 }
  0x50   : > { %p2522_p3 = pneg %p2521_p10 }
  0x52   : > { %p2527_p7 = pnand %p2525_p5, %p2522_p3 }
  0x54   : > { %2530 = shalt.err (!%p2527_p7)
}
  0x55   : > { %s2531_s11 = scalar_lea.vmem %s224_s13, 64  ;;  %p2539_p1 = scmp.lt.s32.totalorder %s224_s13, %s224_s13 }
  0x56   : > { %p2532_p9 = scmp.ne.s32.totalorder %s224_s13, %s2531_s11  ;;  %p2540_p4 = scmp.lt.s32.totalorder %s2531_s11, %s2531_s11 }
  0x58   : > { %p2534_p12 = pnand %p2532_p9, %p2818_p13  ;;  %p2541_p8 = por %p2540_p4, %p2539_p1 }
  0x5a   : > { %p2535_p0 = pneg %p2534_p12 }
  0x5c   : > { %p2542_p2 = pnand %p2541_p8, %p2535_p0 }
  0x5e   : > { %2545 = shalt.err (!%p2542_p2)
}
  0x5f   : > { %2162 = dma.hbm_to_vmem [thread:$0]  (!%p2804_p11), %s3608_s2, 64, %s224_s13, [#allocation7]  }
  0x60   : > { %s2546_s24 = scalar_lea.hbm %s3610_s4, 16 }
  0x61   : > { %p2547_p6 = scmp.ne.s32.totalorder %s3610_s4, %s2546_s24  ;;  %p2553_p2 = scmp.lt.u32.totalorder %s2546_s24, %s3610_s4 }
  0x63   : > { %p2549_p10 = pnand %p2547_p6, %p2818_p13 }
  0x65   : > { %p2550_p3 = pneg %p2549_p10 }
  0x67   : > { %p2555_p8 = pnand %p2553_p2, %p2550_p3 }
  0x69   : > { %2558 = shalt.err (!%p2555_p8)
}
  0x6a   : > { %s2559_s13 = scalar_lea.vmem %s2865_s15, 16  ;;  %s2566_s11 = scalar_lea.vmem %s2865_s15, 32 }
  0x6b   : > { %p2560_p5 = scmp.ne.s32.totalorder %s2865_s15, %s2559_s13  ;;  %p2567_p12 = scmp.lt.s32.totalorder %s2865_s15, %s2865_s15 }
  0x6c   : > { %p2568_p0 = scmp.lt.s32.totalorder %s2566_s11, %s2559_s13 }
  0x6d   : > { %p2562_p7 = pnand %p2560_p5, %p2818_p13 }
  0x6e   : > { %p2569_p1 = por %p2568_p0, %p2567_p12 }
  0x6f   : > { %p2563_p9 = pneg %p2562_p7 }
  0x71   : > { %p2570_p4 = pnand %p2569_p1, %p2563_p9 }
  0x73   : > { %2573 = shalt.err (!%p2570_p4)
}
  0x74   : > { %2168 = dma.hbm_to_vmem [thread:$0]  (!%p2804_p11), %s3610_s4, 16, %s2865_s15, [#allocation10]  }
  0x75   : > { %s35_s16 = sadd.s32 1, %s2690_s22  ;;  %s42_s14 = sadd.s32 1, %s2682_s20 }
  0x76   : > { %p37_p13 = scmp.ge.s32.totalorder %s35_s16, 2  ;;  %p49_p6 = scmp.ne.s32.totalorder %s2682_s20, %s2678_s19 }
  0x77   : > { %p50_p10 = scmp.eq.s32.totalorder %s2694_s23, 0  ;;  %p2181_p3 = scmp.lt.s32.totalorder %s2694_s23, 2 }
  0x78   : > { %s3652_s16 = smov (%p37_p13, %s35_s16), 0  ;;  %p3627_p8 = scmp.ne.s32.totalorder %s3619_s27, 0 }
  0x79   : > { %p51_p2 = por %p50_p10, %p49_p6  ;;  %s39_s17 = ssub.s32 %s2690_s22, %s3652_s16 }
  0x7a   : > { %p2919_p5 = por %p3627_p8, %p49_p6  ;;  %s261_s24 = sand.u32 1, %s2682_s20  }
  0x7b   : > { %p40_p7 = scmp.eq.s32.totalorder %s39_s17, 0  ;;  %s1918_s15 = sshll.u32 %s261_s24, 6 }
  0x7c   : > { %s2006_s25 = sshll.u32 %s2690_s22, 10  ;;  %s265_s27 = scalar_lea.vmem [#allocation3], %s1918_s15 }
  0x7d   : > { %s2928_s7 = scalar_select %p40_p7, %s2682_s20, %s42_s14  }
  0x7e   : > { %s2933_s13 = scalar_lea.hbm %s3606_s0, %s2006_s25  ;;  %s272_s11 = sshll.u32 %s265_s27, 4  ;;  %s2941_s11 = int_to_ptr.vmem [resolvable:$true] %s272_s11 }
  0x7f   : > { %p2937_p11 = pnand %p2181_p3, %p51_p2  ;;  %s2943_s12 = scalar_lea.sflag [#allocation4], %s261_s24 }
  0x80   : > { %s2574_s14 = scalar_lea.hbm %s2933_s13, 1024  ;;  %s2579_s25 = scalar_lea.hbm %s3606_s0, 2048 }
  0x81   : > { %p2575_p9 = scmp.ne.s32.totalorder %s2933_s13, %s2574_s14  ;;  %p2576_p12 = pneg %p2937_p11 }
  0x82   : > { %p2580_p4 = scmp.lt.u32.totalorder %s2933_s13, %s3606_s0  ;;  %p2581_p13 = scmp.lt.u32.totalorder %s2579_s25, %s2574_s14 }
  0x83   : > { %p2577_p0 = pnand %p2576_p12, %p2575_p9  ;;  %p2583_p10 = scmp.lt.u32.totalorder %s2574_s14, %s2933_s13 }
  0x84   : > { %p2582_p6 = por %p2581_p13, %p2580_p4 }
  0x85   : > { %p2578_p1 = pneg %p2577_p0 }
  0x86   : > { %p2584_p3 = por %p2583_p10, %p2582_p6 }
  0x88   : > { %p2585_p2 = pnand %p2584_p3, %p2578_p1 }
  0x8a   : > { %2588 = shalt.err (!%p2585_p2)
}
  0x8b   : > { %s2589_s24 = scalar_lea.vmem %s2941_s11, 1024  ;;  %s2704_s27 = smov [#allocation3]  }
  0x8c   : > { %p2590_p8 = scmp.ne.s32.totalorder %s2941_s11, %s2589_s24  ;;  %s2594_s17 = sshll.u32 %s2704_s27, 4  ;;  %s2595_s17 = int_to_ptr.vmem [resolvable:$false] %s2594_s17 }
  0x8d   : > { %s2596_s15 = scalar_lea.vmem %s2595_s17, 2048  ;;  %p2597_p0 = scmp.lt.s32.totalorder %s2941_s11, %s2595_s17 }
  0x8e   : > { %p2592_p7 = pnand %p2590_p8, %p2576_p12  ;;  %p2598_p4 = scmp.lt.s32.totalorder %s2596_s15, %s2589_s24 }
  0x90   : > { %p2593_p9 = pneg %p2592_p7  ;;  %p2599_p13 = por %p2598_p4, %p2597_p0 }
  0x92   : > { %p2600_p6 = pnand %p2599_p13, %p2593_p9 }
  0x94   : > { %2603 = shalt.err (!%p2600_p6)
}
  0x95   : > { %2172 = dma.hbm_to_vmem [thread:$0]  (!%p2937_p11), %s2933_s13, 1024, %s2941_s11, %s2943_s12, %s2700_s6, %s2700_s6, %s2701_s29  }
  0x96   : > { %p3630_p12 = scmp.ne.s32.totalorder %s3623_s30, 0 }
  0x98   : > { %284 = sbr.rel (%p3630_p12) target bundleno = 768 (0x300), region = 40 }
  0x9f   : > { %s2977_s14 = sand.u32 1, %s2678_s19   ;;  %p3631_p1 = scmp.ne.s32.totalorder %s3620_s28, 0 }
  0xa0   : > { %s1922_s25 = sshll.u32 %s2977_s14, 6  ;;  %s287_s9 = scalar_lea.sflag [#allocation4], %s2977_s14 }
  0xa1   : > { %s2981_s10 = scalar_lea.vmem [#allocation3], %s1922_s25 }
  0xa2   : > { %2657 = dma.done.wait (%p3631_p1), %s287_s9, 1024  }
  0xa3   : > { %2659 = vsyncadd (%p3631_p1), %s287_s9, 4294966272  ;;  %p3632_p11 = scmp.ne.s32.totalorder %s3618_s26, 0 }
  0xa5   : > { %2661 = dma.done.wait (%p3632_p11), [#allocation7], 4160  }
  0xa6   : > { %2663 = vsyncadd (%p3632_p11), [#allocation7], 4294963136 }
  0xa7   : > { %2665 = dma.done.wait (%p3632_p11), [#allocation10], 4112  }
  0xa8   : > { %2667 = vsyncadd (%p3632_p11), [#allocation10], 4294963184  ;;  %v2705_v0 = vmov 0   ;;  %v2246_v1 = vld [vmem:[#allocation6 + $0x4] ss:$16 sps:$4 sm:$0xff]   ;;  %v2306_v38 = vld [vmem:[#allocation9 + $0x48] sm:$0xff]  }
  0xa9   : > { %669 = vmatprep.mubr.bf16.mxu0 %v2705_v0  ;;  %782 = vmatprep.mubr.bf16.mxu1 %v2705_v0  ;;  %v2248_v2 = vld [vmem:[#allocation6 + $0xc] ss:$16 sps:$4 sm:$0xff]   ;;  %v2250_v3 = vld [vmem:[#allocation6] ss:$16 sps:$4 sm:$0xff]   ;;  %v2251_v4 = vld [vmem:[#allocation6 + $0x8] ss:$16 sps:$4 sm:$0xff]  }
  0xaa   : > { %637 = vmatprep.subr.bf16.mxu0 %v2246_v1  ;;  %750 = vmatprep.subr.bf16.mxu1 %v2248_v2  ;;  %v2252_v5 = vld [vmem:[#allocation6 + $0x24] ss:$16 sps:$4 sm:$0xff]   ;;  %v2254_v6 = vld [vmem:[#allocation6 + $0x2c] ss:$16 sps:$4 sm:$0xff]   ;;  %v2256_v7 = vld [vmem:[#allocation6 + $0x20] ss:$16 sps:$4 sm:$0xff]  }
  0xab   : > { %638 = vmatpush1.bf16.msra.mxu0 %v2250_v3  ;;  %751 = vmatpush1.bf16.msra.mxu1 %v2251_v4  ;;  %v2257_v8 = vld [vmem:[#allocation6 + $0x28] ss:$16 sps:$4 sm:$0xff]   ;;  %v2258_v9 = vld [vmem:[#allocation6 + $0x44] ss:$16 sps:$4 sm:$0xff]   ;;  %v2260_v10 = vld [vmem:[#allocation6 + $0x4c] ss:$16 sps:$4 sm:$0xff]  }
  0xac   : > { %639 = vmatprep.subr.bf16.mxu0 %v2252_v5  ;;  %752 = vmatprep.subr.bf16.mxu1 %v2254_v6  ;;  %v2262_v11 = vld [vmem:[#allocation6 + $0x40] ss:$16 sps:$4 sm:$0xff]   ;;  %v2263_v12 = vld [vmem:[#allocation6 + $0x48] ss:$16 sps:$4 sm:$0xff]   ;;  %v2264_v13 = vld [vmem:[#allocation6 + $0x64] ss:$16 sps:$4 sm:$0xff]  }
  0xad   : > { %v2266_v14 = vld [vmem:[#allocation6 + $0x6c] ss:$16 sps:$4 sm:$0xff]   ;;  %v2268_v15 = vld [vmem:[#allocation6 + $0x60] ss:$16 sps:$4 sm:$0xff]   ;;  %v2269_v16 = vld [vmem:[#allocation6 + $0x68] ss:$16 sps:$4 sm:$0xff]  }
  0xae   : > { %v2270_v17 = vld [vmem:[#allocation6 + $0x84] ss:$16 sps:$4 sm:$0xff]   ;;  %v2272_v18 = vld [vmem:[#allocation6 + $0x8c] ss:$16 sps:$4 sm:$0xff]   ;;  %v2274_v19 = vld [vmem:[#allocation6 + $0x80] ss:$16 sps:$4 sm:$0xff]  }
  0xaf   : > { %640 = vmatpush1.bf16.msra.mxu0 %v2256_v7  ;;  %753 = vmatpush1.bf16.msra.mxu1 %v2257_v8  ;;  %v2275_v20 = vld [vmem:[#allocation6 + $0x88] ss:$16 sps:$4 sm:$0xff]   ;;  %v2276_v21 = vld [vmem:[#allocation6 + $0xa4] ss:$16 sps:$4 sm:$0xff]   ;;  %v2278_v22 = vld [vmem:[#allocation6 + $0xac] ss:$16 sps:$4 sm:$0xff]  }
  0xb0   : > { %641 = vmatprep.subr.bf16.mxu0 %v2258_v9  ;;  %754 = vmatprep.subr.bf16.mxu1 %v2260_v10  ;;  %v2280_v23 = vld [vmem:[#allocation6 + $0xa0] ss:$16 sps:$4 sm:$0xff]   ;;  %v2281_v24 = vld [vmem:[#allocation6 + $0xa8] ss:$16 sps:$4 sm:$0xff]   ;;  %v2282_v25 = vld [vmem:[#allocation6 + $0xc4] ss:$16 sps:$4 sm:$0xff]   ;;  %v409_v9 = vlaneseq }
  0xb1   : > { %v2284_v26 = vld [vmem:[#allocation6 + $0xcc] ss:$16 sps:$4 sm:$0xff]   ;;  %v2286_v27 = vld [vmem:[#allocation6 + $0xc0] ss:$16 sps:$4 sm:$0xff]   ;;  %v2287_v28 = vld [vmem:[#allocation6 + $0xc8] ss:$16 sps:$4 sm:$0xff]  }
  0xb2   : > { %v2288_v29 = vld [vmem:[#allocation6 + $0xe4] ss:$16 sps:$4 sm:$0xff]   ;;  %v2290_v30 = vld [vmem:[#allocation6 + $0xec] ss:$16 sps:$4 sm:$0xff]   ;;  %v2292_v31 = vld [vmem:[#allocation6 + $0xe0] ss:$16 sps:$4 sm:$0xff]  }
  0xb3   : > { %642 = vmatpush1.bf16.msra.mxu0 %v2262_v11  ;;  %755 = vmatpush1.bf16.msra.mxu1 %v2263_v12  ;;  %v2293_v32 = vld [vmem:[#allocation6 + $0xe8] ss:$16 sps:$4 sm:$0xff]   ;;  %v2294_v33 = vld [vmem:[%s2981_s10] sm:$0xff]   ;;  %v2307_v39 = vld [vmem:[#allocation9 + $0xc8] sm:$0xff]   ;;  %v410_v10 = vshrl.u32 %v409_v9, 7  ;;  %s1927_s26 = sshll.u32 %s2977_s14, 7 }
  0xb4   : > { %643 = vmatprep.subr.bf16.mxu0 %v2264_v13  ;;  %756 = vmatprep.subr.bf16.mxu1 %v2266_v14  ;;  %v2302_v34 = vld [vmem:[#allocation9 + $0x40] sm:$0xff]   ;;  %v2308_v40 = vld [vmem:[#allocation9 + $0x8] sm:$0xff]   ;;  %v2310_v43 = vld [vmem:[#allocation9 + $0x50] sm:$0xff]   ;;  %s3517_s28 = scalar_lea.vmem [#allocation12], %s1927_s26  ;;  %s2007_s30 = sshll.u32 %s2686_s21, 11 }
  0xb5   : > { %v2303_v35 = vld [vmem:[#allocation9 + $0xc0] sm:$0xff]   ;;  %v2309_v42 = vld [vmem:[#allocation9 + $0x88] sm:$0xff]   ;;  %v2311_v44 = vld [vmem:[#allocation9 + $0xd0] sm:$0xff]   ;;  %v411_v11 = vsub.s32 0, %v410_v10  ;;  %v419_v12 = vsub.s32 2, %v410_v10  ;;  %v415_v14 = vsub.s32 1, %v410_v10  ;;  %s3552_s11 = scalar_lea.hbm %s3611_s5, %s2007_s30 }
  0xb6   : > { %v2304_v36 = vld [vmem:[#allocation9] sm:$0xff]   ;;  %v2312_v45 = vld [vmem:[#allocation9 + $0x10] sm:$0xff]   ;;  %v2314_v47 = vld [vmem:[#allocation9 + $0x58] sm:$0xff]   ;;  %s1785_s6 = sshll.u32 %s3517_s28, 4  ;;  %s1772_s1 = scalar_lea.sflag [#allocation5], %s2977_s14  ;;  %s3554_s6 = int_to_ptr.vmem [resolvable:$true] %s1785_s6 }
  0xb7   : > { %644 = vmatpush1.bf16.msra.mxu0 %v2268_v15  ;;  %757 = vmatpush1.bf16.msra.mxu1 %v2269_v16  ;;  %v2305_v37 = vld [vmem:[#allocation9 + $0x80] sm:$0xff]   ;;  %v2313_v46 = vld [vmem:[#allocation9 + $0x90] sm:$0xff]   ;;  %v2315_v48 = vld [vmem:[#allocation9 + $0xd8] sm:$0xff]   ;;  %v423_v15 = vsub.s32 3, %v410_v10  ;;  %s2604_s21 = scalar_lea.vmem %s3554_s6, 2048  ;;  %s2706_s12 = smov [#allocation12]  }
  0xb8   : > { %645 = vmatprep.subr.bf16.mxu0 %v2270_v17  ;;  %758 = vmatprep.subr.bf16.mxu1 %v2272_v18  ;;  %v2295_v41 = vld [vmem:[%s2981_s10 + $0x8] sm:$0xff]   ;;  %v2316_v49 = vld [vmem:[#allocation9 + $0x18] sm:$0xff]   ;;  %v2296_v50 = vld [vmem:[%s2981_s10 + $0x10] sm:$0xff]   ;;  %p2605_p10 = scmp.ne.s32.totalorder %s3554_s6, %s2604_s21  ;;  %s2608_s24 = sshll.u32 %s2706_s12, 4  ;;  %s2609_s24 = int_to_ptr.vmem [resolvable:$false] %s2608_s24 }
  0xb9   : > { %v2317_v51 = vld [vmem:[#allocation9 + $0x98] sm:$0xff]   ;;  %v2318_v52 = vld [vmem:[#allocation9 + $0x60] sm:$0xff]   ;;  %v2300_v59 = vld [vmem:[%s2981_s10 + $0x30] sm:$0xff]   ;;  %s2610_s27 = scalar_lea.vmem %s2609_s24, 4096  ;;  %p2611_p8 = scmp.lt.s32.totalorder %s3554_s6, %s2609_s24 }
  0xba   : > { %v2319_v53 = vld [vmem:[#allocation9 + $0xe0] sm:$0xff]   ;;  %v2297_v56 = vld [vmem:[%s2981_s10 + $0x18] sm:$0xff]   ;;  %v2322_v61 = vld [vmem:[#allocation9 + $0x68] sm:$0xff]   ;;  %p2606_p3 = pnand %p2605_p10, %p2919_p5  ;;  %p2612_p7 = scmp.lt.s32.totalorder %s2610_s27, %s2604_s21 }
  0xbb   : > { %646 = vmatpush1.bf16.msra.mxu0 %v2274_v19  ;;  %759 = vmatpush1.bf16.msra.mxu1 %v2275_v20  ;;  %v2320_v54 = vld [vmem:[#allocation9 + $0x20] sm:$0xff]   ;;  %v2301_v60 = vld [vmem:[%s2981_s10 + $0x38] sm:$0xff]   ;;  %v2323_v62 = vld [vmem:[#allocation9 + $0xe8] sm:$0xff]  }
  0xbc   : > { %647 = vmatprep.subr.bf16.mxu0 %v2276_v21  ;;  %760 = vmatprep.subr.bf16.mxu1 %v2278_v22  ;;  %v2321_v55 = vld [vmem:[#allocation9 + $0xa0] sm:$0xff]   ;;  %v2324_v63 = vld [vmem:[#allocation9 + $0x28] sm:$0xff]   ;;  %v2326_v2 = vld [vmem:[#allocation9 + $0x70] sm:$0xff]   ;;  %p2607_p2 = pneg %p2606_p3  ;;  %p2613_p9 = por %p2612_p7, %p2611_p8 }
  0xbd   : > { %v2298_v57 = vld [vmem:[%s2981_s10 + $0x20] sm:$0xff]   ;;  %v2299_v58 = vld [vmem:[%s2981_s10 + $0x28] sm:$0xff]   ;;  %v2327_v3 = vld [vmem:[#allocation9 + $0xf0] sm:$0xff]  }
  0xbe   : > { %v2325_v1 = vld [vmem:[#allocation9 + $0xa8] sm:$0xff]   ;;  %v2328_v4 = vld [vmem:[#allocation9 + $0x30] sm:$0xff]   ;;  %v2331_v6 = vld [vmem:[#allocation9 + $0xf8] sm:$0xff]   ;;  %p2614_p0 = pnand %p2613_p9, %p2607_p2 }
  0xbf   : > { %648 = vmatpush1.bf16.msra.mxu0 %v2280_v23  ;;  %761 = vmatpush1.bf16.msra.mxu1 %v2281_v24  ;;  %v2329_v5 = vld [vmem:[#allocation9 + $0xb0] sm:$0xff]   ;;  %v2332_v7 = vld [vmem:[#allocation9 + $0x38] sm:$0xff]  }
  0xc0   : > { %649 = vmatprep.subr.bf16.mxu0 %v2282_v25  ;;  %762 = vmatprep.subr.bf16.mxu1 %v2284_v26  ;;  %v2333_v8 = vld [vmem:[#allocation9 + $0xb8] sm:$0xff]  }
  0xc1   : > { %v407_v13 = vld [vmem:[#allocation8] sm:$0xf] }
  0xc2   : > { %v3019_v16 = vrot.slane %v407_v13, %v411_v11  ;;  %v3021_v17 = vrot.slane %v407_v13, %v419_v12  ;;  %v3023_v18 = vrot.slane %v407_v13, %v415_v14  ;;  %v3025_v19 = vrot.slane %v407_v13, %v423_v15 }
  0xc3   : > { %650 = vmatpush1.bf16.msra.mxu0 %v2286_v27  ;;  %763 = vmatpush1.bf16.msra.mxu1 %v2287_v28 }
  0xc4   : > { %651 = vmatprep.subr.bf16.mxu0 %v2288_v29  ;;  %764 = vmatprep.subr.bf16.mxu1 %v2290_v30 }
  0xc7   : > { %652 = vmatpush1.bf16.msra.mxu0 %v2292_v31  ;;  %765 = vmatpush1.bf16.msra.mxu1 %v2293_v32 }
  0xc8   : > { %2008 = vmatprep.subr.bf16.mxu0 %v2302_v34  ;;  %2072 = vmatprep.subr.bf16.mxu1 %v2303_v35 }
  0xca   : > { %670 = vmatmul.mubr.bf16.vlgmr.msra.gmra.mrb[0].mxu0 %v2294_v33  ;;  %783 = vmatmul.mubr.bf16.vlgmr.msra.gmra.mrb[0].mxu1 %v2294_v33 }
  0xcb   : > { %679 = vmatprep.mubr.bf16.mxu0 %v2705_v0  ;;  %792 = vmatprep.mubr.bf16.mxu1 %v2705_v0 }
  0xcc   : > { %2009 = vmatpush3.bf16.msra.mxu0 %v2304_v36  ;;  %2073 = vmatpush3.bf16.msra.mxu1 %v2305_v37 }
  0xcd   : > { %2010 = vmatprep.subr.bf16.mxu0 %v2306_v38  ;;  %2074 = vmatprep.subr.bf16.mxu1 %v2307_v39 }
  0xd0   : > { %2011 = vmatpush3.bf16.msra.mxu0 %v2308_v40  ;;  %2075 = vmatpush3.bf16.msra.mxu1 %v2309_v42 }
  0xd1   : > { %2012 = vmatprep.subr.bf16.mxu0 %v2310_v43  ;;  %2076 = vmatprep.subr.bf16.mxu1 %v2311_v44 }
  0xd2   : > { %680 = vmatmul.mubr.bf16.gmra.mrb[4].mxu0 %v2295_v41  ;;  %793 = vmatmul.mubr.bf16.gmra.mrb[4].mxu1 %v2295_v41 }
  0xd3   : > { %689 = vmatprep.mubr.bf16.mxu0 %v2705_v0  ;;  %802 = vmatprep.mubr.bf16.mxu1 %v2705_v0 }
  0xd4   : > { %2013 = vmatpush3.bf16.msra.mxu0 %v2312_v45  ;;  %2077 = vmatpush3.bf16.msra.mxu1 %v2313_v46 }
  0xd5   : > { %2014 = vmatprep.subr.bf16.mxu0 %v2314_v47  ;;  %2078 = vmatprep.subr.bf16.mxu1 %v2315_v48 }
  0xd8   : > { %2015 = vmatpush3.bf16.msra.mxu0 %v2316_v49  ;;  %2079 = vmatpush3.bf16.msra.mxu1 %v2317_v51 }
  0xd9   : > { %2016 = vmatprep.subr.bf16.mxu0 %v2318_v52  ;;  %2080 = vmatprep.subr.bf16.mxu1 %v2319_v53 }
  0xda   : > { %690 = vmatmul.mubr.bf16.gmra.mrb[8].mxu0 %v2296_v50  ;;  %803 = vmatmul.mubr.bf16.gmra.mrb[8].mxu1 %v2296_v50 }
  0xdb   : > { %699 = vmatprep.mubr.bf16.mxu0 %v2705_v0  ;;  %812 = vmatprep.mubr.bf16.mxu1 %v2705_v0 }
  0xdc   : > { %2017 = vmatpush3.bf16.msra.mxu0 %v2320_v54  ;;  %2081 = vmatpush3.bf16.msra.mxu1 %v2321_v55 }
  0xdd   : > { %2018 = vmatprep.subr.bf16.mxu0 %v2322_v61  ;;  %2082 = vmatprep.subr.bf16.mxu1 %v2323_v62 }
  0xe0   : > { %2019 = vmatpush3.bf16.msra.mxu0 %v2324_v63  ;;  %2083 = vmatpush3.bf16.msra.mxu1 %v2325_v1 }
  0xe1   : > { %2020 = vmatprep.subr.bf16.mxu0 %v2326_v2  ;;  %2084 = vmatprep.subr.bf16.mxu1 %v2327_v3 }
  0xe2   : > { %700 = vmatmul.mubr.bf16.gmra.mrb[12].mxu0 %v2297_v56  ;;  %813 = vmatmul.mubr.bf16.gmra.mrb[12].mxu1 %v2297_v56 }
  0xe3   : > { %709 = vmatprep.mubr.bf16.mxu0 %v2705_v0  ;;  %822 = vmatprep.mubr.bf16.mxu1 %v2705_v0 }
  0xe4   : > { %2021 = vmatpush3.bf16.msra.mxu0 %v2328_v4  ;;  %2085 = vmatpush3.bf16.msra.mxu1 %v2329_v5 }
  0xe5   : > { %2086 = vmatprep.subr.bf16.mxu1 %v2331_v6 }
  0xe8   : > { %2087 = vmatpush3.bf16.msra.mxu1 %v2333_v8 }
  0xea   : > { %710 = vmatmul.mubr.bf16.gmra.mrb[16].mxu0 %v2298_v57  ;;  %823 = vmatmul.mubr.bf16.gmra.mrb[16].mxu1 %v2298_v57 }
  0xeb   : > { %719 = vmatprep.mubr.bf16.mxu0 %v2705_v0  ;;  %832 = vmatprep.mubr.bf16.mxu1 %v2705_v0 }
  0xf2   : > { %720 = vmatmul.mubr.bf16.gmra.mrb[20].mxu0 %v2299_v58  ;;  %833 = vmatmul.mubr.bf16.gmra.mrb[20].mxu1 %v2299_v58 }
  0xf3   : > { %729 = vmatprep.mubr.bf16.mxu0 %v2705_v0  ;;  %842 = vmatprep.mubr.bf16.mxu1 %v2705_v0 }
  0xfa   : > { %730 = vmatmul.mubr.bf16.gmra.mrb[24].mxu0 %v2300_v59  ;;  %843 = vmatmul.mubr.bf16.gmra.mrb[24].mxu1 %v2300_v59 }
  0xfb   : > { %739 = vmatprep.mubr.bf16.mxu0 %v2705_v0  ;;  %852 = vmatprep.mubr.bf16.mxu1 %v2705_v0  ;;  %v2330_v0 = vld [vmem:[#allocation9 + $0x78] sm:$0xff]  }
  0xfc   : > { %2022 = vmatprep.subr.bf16.mxu0 %v2330_v0 }
  0xfd   : > { %2023 = vmatpush3.bf16.msra.mxu0 %v2332_v7 }
 0x102   : > { %740 = vmatmul.mubr.bf16.gmra.mrb[28].mxu0 %v2301_v60  ;;  %853 = vmatmul.mubr.bf16.gmra.mrb[28].mxu1 %v2301_v60 }
 0x19d   : > { %v671_v20 = vpop.f32.mrb[0].mxu0  ;;  %v784_v21 = vpop.f32.mrb[0].mxu1 }
 0x19e   : > { %v672_v22 = vadd.f32 %v671_v20, %v3019_v16  ;;  %v785_v23 = vadd.f32 %v784_v21, %v3021_v17  ;;  %v673_v24 = vpop.f32.mrb[1].mxu0  ;;  %v786_v25 = vpop.f32.mrb[1].mxu1 }
 0x19f   : > { %v674_v26 = vadd.f32 %v673_v24, %v3023_v18  ;;  %v787_v27 = vadd.f32 %v786_v25, %v3025_v19  ;;  %v675_v28 = vpop.f32.mrb[2].mxu0  ;;  %v788_v29 = vpop.f32.mrb[2].mxu1 }
 0x1a0   : > { %v927_v30 = vmul.f32 0.70710677, %v672_v22  ;;  %v929_v31 = vmul.f32 0.70710677, %v785_v23  ;;  %v676_v34 = vadd.f32 %v675_v28, %v3019_v16  ;;  %v789_v35 = vadd.f32 %v788_v29, %v3021_v17  ;;  %v677_v36 = vpop.f32.mrb[3].mxu0  ;;  %v790_v37 = vpop.f32.mrb[3].mxu1 }
 0x1a1   : > { %v928_v32 = vmul.f32 0.70710677, %v674_v26  ;;  %v930_v33 = vmul.f32 0.70710677, %v787_v27  ;;  %v678_v38 = vadd.f32 %v677_v36, %v3023_v18  ;;  %v791_v39 = vadd.f32 %v790_v37, %v3025_v19 }
 0x1a2   : > { %2334 = verf.f32 %v927_v30  ;;  %v931_v40 = vmul.f32 0.70710677, %v676_v34  ;;  %v933_v41 = vmul.f32 0.70710677, %v789_v35  ;;  %v863_v58 = vmul.f32 0.5, %v672_v22 }
 0x1a3   : > { %2336 = verf.f32 %v929_v31  ;;  %v932_v42 = vmul.f32 0.70710677, %v678_v38  ;;  %v934_v44 = vmul.f32 0.70710677, %v791_v39  ;;  %v865_v2 = vmul.f32 0.5, %v785_v23 }
 0x1a4   : > { %2338 = verf.f32 %v928_v32  ;;  %v864_v3 = vmul.f32 0.5, %v674_v26  ;;  %v3042_v4 = vmul.f32 0.5, %v787_v27  ;;  %v867_v5 = vmul.f32 0.5, %v676_v34 }
 0x1a5   : > { %2340 = verf.f32 %v930_v33  ;;  %v681_v43 = vpop.f32.mrb[4].mxu0  ;;  %v794_v46 = vpop.f32.mrb[4].mxu1  ;;  %v869_v7 = vmul.f32 0.5, %v789_v35  ;;  %v3044_v12 = vmul.f32 0.5, %v678_v38  ;;  %v3046_v13 = vmul.f32 0.5, %v791_v39 }
 0x1a6   : > { %2342 = verf.f32 %v931_v40  ;;  %v682_v45 = vadd.f32 %v681_v43, %v3019_v16  ;;  %v683_v47 = vpop.f32.mrb[5].mxu0  ;;  %v795_v48 = vadd.f32 %v794_v46, %v3021_v17  ;;  %v796_v50 = vpop.f32.mrb[5].mxu1 }
 0x1a7   : > { %2344 = verf.f32 %v933_v41  ;;  %v684_v49 = vadd.f32 %v683_v47, %v3023_v18  ;;  %v685_v51 = vpop.f32.mrb[6].mxu0  ;;  %v797_v53 = vadd.f32 %v796_v50, %v3025_v19  ;;  %v798_v54 = vpop.f32.mrb[6].mxu1 }
 0x1a8   : > { %2346 = verf.f32 %v932_v42  ;;  %v935_v52 = vmul.f32 0.70710677, %v682_v45  ;;  %v687_v55 = vpop.f32.mrb[7].mxu0  ;;  %v937_v56 = vmul.f32 0.70710677, %v795_v48  ;;  %v800_v57 = vpop.f32.mrb[7].mxu1  ;;  %v686_v61 = vadd.f32 %v685_v51, %v3019_v16 }
 0x1a9   : > { %2348 = verf.f32 %v934_v44  ;;  %v936_v59 = vmul.f32 0.70710677, %v684_v49  ;;  %v938_v60 = vmul.f32 0.70710677, %v797_v53  ;;  %v799_v62 = vadd.f32 %v798_v54, %v3021_v17 }
 0x1aa   : > { %2350 = verf.f32 %v935_v52  ;;  %v688_v63 = vadd.f32 %v687_v55, %v3023_v18  ;;  %v939_v8 = vmul.f32 0.70710677, %v686_v61  ;;  %v801_v15 = vadd.f32 %v800_v57, %v3025_v19 }
 0x1ab   : > { %2352 = verf.f32 %v937_v56  ;;  %v941_v14 = vmul.f32 0.70710677, %v799_v62  ;;  %v3049_v23 = vmul.f32 0.5, %v682_v45  ;;  %v3051_v28 = vmul.f32 0.5, %v795_v48 }
 0x1ac   : > { %v2335_v1 = vpop.eup %2334  ;;  %2354 = verf.f32 %v936_v59  ;;  %v940_v24 = vmul.f32 0.70710677, %v688_v63  ;;  %v3053_v29 = vmul.f32 0.5, %v684_v49  ;;  %v3055_v30 = vmul.f32 0.5, %v797_v53 }
 0x1ad   : > { %v2337_v0 = vpop.eup %2336  ;;  %v1055_v6 = vadd.f32 1.0, %v2335_v1  ;;  %v691_v9 = vpop.f32.mrb[8].mxu0  ;;  %2356 = verf.f32 %v938_v60  ;;  %v3061_v37 = vmul.f32 0.5, %v686_v61  ;;  %v942_v41 = vmul.f32 0.70710677, %v801_v15 }
 0x1ae   : > { %v804_v10 = vpop.f32.mrb[8].mxu1  ;;  %v2339_v11 = vpop.eup %2338  ;;  %v1057_v22 = vadd.f32 1.0, %v2337_v0  ;;  %2358 = verf.f32 %v939_v8  ;;  %v692_v42 = vadd.f32 %v691_v9, %v3019_v16  ;;  %v3076_v54 = vmul.f32 0.5, %v799_v62 }
 0x1af   : > { %v693_v20 = vpop.f32.mrb[9].mxu0  ;;  %v2341_v21 = vpop.eup %2340  ;;  %v3059_v34 = vmul.f32 %v1055_v6, %v863_v58  ;;  %v1056_v35 = vadd.f32 1.0, %v2339_v11  ;;  %2360 = verf.f32 %v941_v14  ;;  %v805_v46 = vadd.f32 %v804_v10, %v3021_v17 }
 0x1b0   : > { %v806_v25 = vpop.f32.mrb[9].mxu1  ;;  %v695_v26 = vpop.f32.mrb[10].mxu0  ;;  %v3066_v44 = vmul.f32 %v1057_v22, %v865_v2  ;;  %2362 = verf.f32 %v940_v24  ;;  %v1058_v48 = vadd.f32 1.0, %v2341_v21  ;;  %v943_v50 = vmul.f32 0.70710677, %v692_v42 }
 0x1b1   : > { %v2343_v27 = vpop.eup %2342  ;;  %v808_v31 = vpop.f32.mrb[10].mxu1  ;;  %v694_v51 = vadd.f32 %v693_v20, %v3023_v18  ;;  %v3078_v55 = vmul.f32 0.5, %v688_v63  ;;  %v3080_v56 = vmul.f32 0.5, %v801_v15  ;;  %v3084_v59 = vmul.f32 %v1056_v35, %v864_v3 }
 0x1b2   : > { %v3057_v32 = vpop.f32.mrb[11].mxu0  ;;  %v2345_v33 = vpop.eup %2344  ;;  %v1059_v36 = vadd.f32 1.0, %v2343_v27  ;;  %2364 = verf.f32 %v942_v41  ;;  %v945_v0 = vmul.f32 0.70710677, %v805_v46  ;;  %v3097_v3 = vmul.f32 %v1058_v48, %v3042_v4 }
 0x1b3   : > { %v3063_v38 = vpop.f32.mrb[11].mxu1  ;;  %v2347_v39 = vpop.eup %2346  ;;  %v1061_v40 = vadd.f32 1.0, %v2345_v33  ;;  %2366 = verf.f32 %v943_v50  ;;  %v944_v9 = vmul.f32 0.70710677, %v694_v51  ;;  %v807_v10 = vadd.f32 %v806_v25, %v3025_v19 }
 0x1b4   : > { %v2349_v43 = vpop.eup %2348  ;;  %v3068_v45 = vmul.f32 %v1059_v36, %v867_v5  ;;  %v1060_v61 = vadd.f32 1.0, %v2347_v39  ;;  %v3104_v20 = vmul.f32 0.5, %v692_v42  ;;  %2368 = verf.f32 %v945_v0 }
 0x1b5   : > { %v2351_v47 = vpop.eup %2350  ;;  %v3071_v49 = vmul.f32 %v1061_v40, %v869_v7  ;;  %v701_v57 = vpop.f32.mrb[12].mxu0  ;;  %v1062_v5 = vadd.f32 1.0, %v2349_v43  ;;  %v696_v21 = vadd.f32 %v695_v26, %v3019_v16  ;;  %v809_v22 = vadd.f32 %v808_v31, %v3021_v17 }
 0x1b6   : > { %v2353_v52 = vpop.eup %2352  ;;  %v1199_v53 = vpack.c.bf16 %v3068_v45, %v3059_v34  ;;  %v3082_v58 = vpop.f32.mrb[12].mxu1  ;;  %v1063_v63 = vadd.f32 1.0, %v2351_v47  ;;  %v1124_v4 = vmul.f32 %v1060_v61, %v3044_v12  ;;  %v3109_v33 = vmul.f32 0.5, %v805_v46 }
 0x1b7   : > { %v1201_v60 = vpack.c.bf16 %v3071_v49, %v3066_v44  ;;  %v3088_v1 = vpop.f32.mrb[13].mxu0  ;;  %v3090_v2 = vpop.f32.mrb[13].mxu1  ;;  %v1065_v8 = vadd.f32 1.0, %v2353_v52  ;;  %2370 = verf.f32 %v944_v9  ;;  %v1126_v25 = vmul.f32 %v1062_v5, %v3046_v13 }
 0x1b8   : > { %v2355_v62 = vpop.eup %2354  ;;  %v3092_v6 = vpop.f32.mrb[14].mxu0  ;;  %v3113_v35 = vmul.f32 %v1063_v63, %v3049_v23  ;;  %v946_v36 = vmul.f32 0.70710677, %v807_v10  ;;  %v947_v39 = vmul.f32 0.70710677, %v696_v21  ;;  %v3118_v31 = vmul.f32 0.5, %v694_v51 }
 0x1b9   : > { %v3094_v7 = vpop.f32.mrb[14].mxu1  ;;  %v3100_v11 = vpop.f32.mrb[15].mxu0  ;;  %v1064_v27 = vadd.f32 1.0, %v2355_v62  ;;  %v3116_v41 = vmul.f32 %v1065_v8, %v3051_v28  ;;  %v949_v42 = vmul.f32 0.70710677, %v809_v22  ;;  %v698_v46 = vadd.f32 %v3057_v32, %v3023_v18 }
 0x1ba   : > { %v3102_v14 = vpop.f32.mrb[15].mxu1  ;;  %v2357_v15 = vpop.eup %2356  ;;  %2372 = verf.f32 %v946_v36  ;;  %v811_v13 = vadd.f32 %v3063_v38, %v3025_v19  ;;  %v3131_v48 = vmul.f32 0.5, %v807_v10  ;;  %v702_v50 = vadd.f32 %v701_v57, %v3019_v16 }
 0x1bb   : > { %v2359_v24 = vpop.eup %2358  ;;  %v1066_v26 = vadd.f32 1.0, %v2357_v15  ;;  %v3129_v28 = vmul.f32 %v1064_v27, %v3053_v29  ;;  %2374 = verf.f32 %v947_v39  ;;  %v3138_v61 = vmul.f32 0.5, %v696_v21 }
 0x1bc   : > { %v2361_v40 = vpop.eup %2360  ;;  %v1067_v43 = vadd.f32 1.0, %v2359_v24  ;;  %2376 = verf.f32 %v949_v42  ;;  %v948_v38 = vmul.f32 0.70710677, %v698_v46  ;;  %v950_v8 = vmul.f32 0.70710677, %v811_v13 }
 0x1bd   : > { %v2363_v12 = vpop.eup %2362  ;;  %v3124_v23 = vpop.f32.mrb[16].mxu0  ;;  %v1069_v32 = vadd.f32 1.0, %v2361_v40  ;;  %v3145_v63 = vmul.f32 %v1066_v26, %v3055_v30  ;;  %v951_v57 = vmul.f32 0.70710677, %v702_v50  ;;  %v815_v21 = vadd.f32 %v3082_v58, %v3021_v17 }
 0x1be   : > { %v3126_v47 = vpop.f32.mrb[16].mxu1  ;;  %v3134_v51 = vpop.f32.mrb[17].mxu0  ;;  %v1068_v0 = vadd.f32 1.0, %v2363_v12  ;;  %v3150_v15 = vmul.f32 %v1067_v43, %v3061_v37  ;;  %2378 = verf.f32 %v948_v38  ;;  %v704_v24 = vadd.f32 %v3088_v1, %v3023_v18 }
 0x1bf   : > { %v3136_v52 = vpop.f32.mrb[17].mxu1  ;;  %v3140_v62 = vpop.f32.mrb[18].mxu0  ;;  %2380 = verf.f32 %v950_v8  ;;  %v817_v30 = vadd.f32 %v3090_v2, %v3025_v19  ;;  %v1200_v36 = vpack.c.bf16 %v1124_v4, %v3084_v59  ;;  %v1202_v39 = vpack.c.bf16 %v1126_v25, %v3097_v3 }
 0x1c0   : > { %v3142_v5 = vpop.f32.mrb[18].mxu1  ;;  %v2365_v29 = vpop.eup %2364  ;;  %v3163_v37 = vmul.f32 %v1069_v32, %v3076_v54  ;;  %v3165_v42 = vmul.f32 0.5, %v809_v22  ;;  %v953_v58 = vmul.f32 0.70710677, %v815_v21  ;;  %v3168_v1 = vmul.f32 %v1068_v0, %v3078_v55 }
 0x1c1   : > { %v3147_v9 = vpop.f32.mrb[19].mxu0  ;;  %v2367_v10 = vpop.eup %2366  ;;  %v1070_v26 = vadd.f32 1.0, %v2365_v29  ;;  %2382 = verf.f32 %v951_v57  ;;  %v952_v38 = vmul.f32 0.70710677, %v704_v24  ;;  %1519 = vmatprep.mubr.bf16.mxu0 %v1200_v36  ;;  %1616 = vmatprep.mubr.bf16.mxu1 %v1202_v39  ;;  %v3170_v59 = vmul.f32 0.5, %v698_v46 }
 0x1c2   : > { %v3156_v27 = vpop.f32.mrb[19].mxu1  ;;  %v2369_v40 = vpop.eup %2368  ;;  %v1071_v43 = vadd.f32 1.0, %v2367_v10  ;;  %v3172_v2 = vmul.f32 0.5, %v811_v13  ;;  %v954_v3 = vmul.f32 0.70710677, %v817_v30  ;;  %v706_v54 = vadd.f32 %v3092_v6, %v3019_v16  ;;  %1520 = vmatmul.mubr.bf16.vlgmr.msra.gmra.mrb[32].mxu0 %v1199_v53  ;;  %1617 = vmatmul.mubr.bf16.vlgmr.msra.gmra.mrb[32].mxu1 %v1201_v60 }
 0x1c3   : > { %v2371_v12 = vpop.eup %2370  ;;  %v1073_v4 = vadd.f32 1.0, %v2369_v40  ;;  %2384 = verf.f32 %v953_v58  ;;  %v819_v25 = vadd.f32 %v3094_v7, %v3021_v17  ;;  %v708_v6 = vadd.f32 %v3100_v11, %v3023_v18 }
 0x1c4   : > { %v2373_v45 = vpop.eup %2372  ;;  %v3195_v44 = vmul.f32 %v1070_v26, %v3080_v56  ;;  %v1072_v49 = vadd.f32 1.0, %v2371_v12  ;;  %2386 = verf.f32 %v952_v38  ;;  %v955_v53 = vmul.f32 0.70710677, %v706_v54 }
 0x1c5   : > { %v3182_v55 = vpop.f32.mrb[20].mxu0  ;;  %v3184_v22 = vpop.f32.mrb[20].mxu1  ;;  %v3202_v7 = vmul.f32 %v1071_v43, %v3104_v20  ;;  %v3204_v11 = vmul.f32 0.5, %v702_v50  ;;  %2388 = verf.f32 %v954_v3  ;;  %v957_v29 = vmul.f32 0.70710677, %v819_v25 }
 0x1c6   : > { %v3190_v46 = vpop.f32.mrb[21].mxu0  ;;  %v3192_v34 = vpop.f32.mrb[21].mxu1  ;;  %v3208_v56 = vmul.f32 0.5, %v815_v21  ;;  %v3210_v57 = vmul.f32 0.5, %v704_v24  ;;  %v956_v10 = vmul.f32 0.70710677, %v708_v6  ;;  %v821_v36 = vadd.f32 %v3102_v14, %v3025_v19 }
 0x1c7   : > { %v3197_v60 = vpop.f32.mrb[22].mxu0  ;;  %v3199_v13 = vpop.f32.mrb[22].mxu1  ;;  %v3217_v20 = vmul.f32 %v1073_v4, %v3109_v33  ;;  %v3219_v50 = vmul.f32 0.5, %v817_v30  ;;  %2390 = verf.f32 %v955_v53  ;;  %v712_v40 = vadd.f32 %v3124_v23, %v3019_v16 }
 0x1c8   : > { %v2375_v32 = vpop.eup %2374  ;;  %v3206_v0 = vpop.f32.mrb[23].mxu0  ;;  %v3224_v21 = vmul.f32 %v1072_v49, %v3118_v31  ;;  %v1074_v24 = vadd.f32 1.0, %v2373_v45  ;;  %2392 = verf.f32 %v957_v29  ;;  %v958_v58 = vmul.f32 0.70710677, %v821_v36 }
 0x1c9   : > { %v2377_v8 = vpop.eup %2376  ;;  %v3214_v39 = vpop.f32.mrb[23].mxu1  ;;  %v1075_v14 = vadd.f32 1.0, %v2375_v32  ;;  %2394 = verf.f32 %v956_v10  ;;  %v959_v38 = vmul.f32 0.70710677, %v712_v40  ;;  %v825_v30 = vadd.f32 %v3126_v47, %v3021_v17 }
 0x1ca   : > { %v2379_v26 = vpop.eup %2378  ;;  %v1077_v43 = vadd.f32 1.0, %v2377_v8  ;;  %2396 = verf.f32 %v958_v58  ;;  %v714_v23 = vadd.f32 %v3134_v51, %v3023_v18  ;;  %v3234_v49 = vmul.f32 0.5, %v706_v54 }
 0x1cb   : > { %v2381_v12 = vpop.eup %2380  ;;  %v1076_v33 = vadd.f32 1.0, %v2379_v26  ;;  %2398 = verf.f32 %v959_v38  ;;  %v827_v53 = vadd.f32 %v3136_v52, %v3025_v19  ;;  %v3243_v47 = vmul.f32 %v1074_v24, %v3131_v48 }
 0x1cc   : > { %v2383_v4 = vpop.eup %2382  ;;  %v1078_v45 = vadd.f32 1.0, %v2381_v12  ;;  %v3245_v51 = vmul.f32 0.5, %v819_v25  ;;  %v3247_v8 = vmul.f32 0.5, %v708_v6  ;;  %v961_v10 = vmul.f32 0.70710677, %v825_v30 }
 0x1cd   : > { %v3230_v3 = vpop.f32.mrb[24].mxu0  ;;  %v3232_v31 = vpop.f32.mrb[24].mxu1  ;;  %v3254_v12 = vmul.f32 %v1075_v14, %v3138_v61  ;;  %v3257_v52 = vmul.f32 %v1077_v43, %v3165_v42  ;;  %v3259_v38 = vmul.f32 0.5, %v821_v36  ;;  %v3261_v48 = vmul.f32 0.5, %v712_v40 }
 0x1ce   : > { %v3238_v32 = vpop.f32.mrb[25].mxu0  ;;  %v3240_v29 = vpop.f32.mrb[25].mxu1  ;;  %v1204_v61 = vpack.c.bf16 %v3168_v1, %v3129_v28  ;;  %v3273_v42 = vmul.f32 %v1078_v45, %v3172_v2  ;;  %2400 = verf.f32 %v961_v10  ;;  %v962_v36 = vmul.f32 0.70710677, %v827_v53 }
 0x1cf   : > { %3633 = vst [vmem:[#allocation18_spill] sm:$0xff] %v3240_v29  ;;  %v3249_v26 = vpop.f32.mrb[26].mxu0  ;;  %v3251_v54 = vpop.f32.mrb[26].mxu1  ;;  %v960_v29 = vmul.f32 0.70710677, %v714_v23  ;;  %v1206_v40 = vpack.c.bf16 %v3195_v44, %v3145_v63  ;;  %v1203_v2 = vpack.c.bf16 %v3150_v15, %v3113_v35  ;;  %v1205_v63 = vpack.c.bf16 %v3163_v37, %v3116_v41 }
 0x1d0   : > { %3634 = vst [vmem:[#allocation19_spill] sm:$0xff] %v3249_v26  ;;  %3635 = vst [vmem:[#allocation20_spill] sm:$0xff] %v3251_v54  ;;  %v2385_v58 = vpop.eup %2384  ;;  %v3263_v25 = vpop.f32.mrb[27].mxu0  ;;  %v3268_v26 = vmul.f32 %v1076_v33, %v3170_v59  ;;  %v1079_v54 = vadd.f32 1.0, %v2383_v4  ;;  %1527 = vmatprep.mubr.bf16.mxu0 %v1204_v61  ;;  %v716_v59 = vadd.f32 %v3140_v62, %v3019_v16  ;;  %v3283_v4 = vmul.f32 0.5, %v714_v23 }
 0x1d1   : > { %v3265_v6 = vpop.f32.mrb[27].mxu1  ;;  %v2387_v24 = vpop.eup %2386  ;;  %v1081_v43 = vadd.f32 1.0, %v2385_v58  ;;  %v829_v33 = vadd.f32 %v3142_v5, %v3021_v17  ;;  %1624 = vmatprep.mubr.bf16.mxu1 %v1206_v40  ;;  %2402 = verf.f32 %v960_v29  ;;  %v3294_v58 = vmul.f32 0.5, %v827_v53  ;;  %1528 = vmatmul.mubr.bf16.gmra.mrb[36].mxu0 %v1203_v2 }
 0x1d2   : > { %3636 = vst [vmem:[#allocation21_spill] sm:$0xff] %v3265_v6  ;;  %v2389_v14 = vpop.eup %2388  ;;  %v3277_v6 = vmul.f32 0.5, %v825_v30  ;;  %v1080_v1 = vadd.f32 1.0, %v2387_v24  ;;  %v3290_v30 = vmul.f32 %v1079_v54, %v3204_v11  ;;  %v963_v62 = vmul.f32 0.70710677, %v716_v59  ;;  %1625 = vmatmul.mubr.bf16.gmra.mrb[36].mxu1 %v1205_v63 }
 0x1d3   : > { %v2391_v28 = vpop.eup %2390  ;;  %v1082_v45 = vadd.f32 1.0, %v2389_v14  ;;  %2404 = verf.f32 %v962_v36  ;;  %v965_v23 = vmul.f32 0.70710677, %v829_v33  ;;  %v718_v35 = vadd.f32 %v3147_v9, %v3023_v18 }
 0x1d4   : > { %v2393_v44 = vpop.eup %2392  ;;  %v3303_v11 = vmul.f32 %v1081_v43, %v3208_v56  ;;  %2406 = verf.f32 %v963_v62  ;;  %v831_v53 = vadd.f32 %v3156_v27, %v3025_v19  ;;  %v722_v29 = vadd.f32 %v3182_v55, %v3019_v16 }
 0x1d5   : > { %v3292_v10 = vpop.f32.mrb[28].mxu0  ;;  %v2395_v5 = vpop.eup %2394  ;;  %v3314_v61 = vmul.f32 %v1080_v1, %v3210_v57  ;;  %v1083_v14 = vadd.f32 1.0, %v2391_v28  ;;  %v1085_v36 = vadd.f32 1.0, %v2393_v44  ;;  %2408 = verf.f32 %v965_v23 }
 0x1d6   : > { %v3298_v41 = vpop.f32.mrb[28].mxu1  ;;  %v3300_v15 = vpop.f32.mrb[29].mxu0  ;;  %v3321_v27 = vmul.f32 %v1082_v45, %v3219_v50  ;;  %v1084_v43 = vadd.f32 1.0, %v2395_v5  ;;  %v964_v55 = vmul.f32 0.70710677, %v718_v35  ;;  %v835_v57 = vadd.f32 %v3184_v22, %v3021_v17 }
 0x1d7   : > { %v2397_v37 = vpop.eup %2396  ;;  %v3309_v54 = vpop.f32.mrb[29].mxu1  ;;  %v966_v2 = vmul.f32 0.70710677, %v831_v53  ;;  %v967_v1 = vmul.f32 0.70710677, %v722_v29  ;;  %v724_v44 = vadd.f32 %v3190_v46, %v3023_v18  ;;  %v837_v50 = vadd.f32 %v3192_v34, %v3025_v19 }
 0x1d8   : > { %v3311_v24 = vpop.f32.mrb[30].mxu0  ;;  %v2399_v9 = vpop.eup %2398  ;;  %v1086_v63 = vadd.f32 1.0, %v2397_v37  ;;  %2410 = verf.f32 %v964_v55  ;;  %v3334_v5 = vmul.f32 %v1083_v14, %v3234_v49  ;;  %v901_v23 = vmul.f32 0.5, %v829_v33 }
 0x1d9   : > { %3637 = vst [vmem:[#allocation22_spill] sm:$0xff] %v3311_v24  ;;  %v3316_v56 = vpop.f32.mrb[30].mxu1  ;;  %v3318_v40 = vpop.f32.mrb[31].mxu0  ;;  %v1087_v62 = vadd.f32 1.0, %v2399_v9  ;;  %v3323_v24 = vmul.f32 0.5, %v716_v59  ;;  %v3337_v59 = vmul.f32 %v1085_v36, %v3245_v51  ;;  %v3340_v22 = vmul.f32 %v1084_v43, %v3247_v8 }
 0x1da   : > { %v3327_v28 = vpop.f32.mrb[31].mxu1  ;;  %v2401_v45 = vpop.eup %2400  ;;  %v969_v37 = vmul.f32 0.70710677, %v835_v57  ;;  %v3342_v9 = vmul.f32 0.5, %v718_v35  ;;  %2412 = verf.f32 %v966_v2  ;;  %v968_v55 = vmul.f32 0.70710677, %v724_v44 }
 0x1db   : > { %v3345_v46 = vmul.f32 %v1086_v63, %v3259_v38  ;;  %v3348_v34 = vmul.f32 %v1087_v62, %v3261_v48  ;;  %v3350_v49 = vmul.f32 0.5, %v831_v53  ;;  %v3352_v14 = vmul.f32 0.5, %v722_v29  ;;  %v2403_v51 = vpop.eup %2402 }
 0x1dc   : > { %v1089_v33 = vadd.f32 1.0, %v2401_v45  ;;  %2414 = verf.f32 %v967_v1  ;;  %v970_v36 = vmul.f32 0.70710677, %v837_v50  ;;  %v1208_v8 = vpack.c.bf16 %v3268_v26, %v3224_v21 }
 0x1dd   : > { %v2405_v35 = vpop.eup %2404  ;;  %2416 = verf.f32 %v969_v37  ;;  %v1210_v38 = vpack.c.bf16 %v3273_v42, %v3243_v47  ;;  %v726_v48 = vadd.f32 %v3197_v60, %v3019_v16  ;;  %v839_v53 = vadd.f32 %v3199_v13, %v3021_v17 }
 0x1de   : > { %v2407_v29 = vpop.eup %2406  ;;  %2418 = verf.f32 %v968_v55  ;;  %1535 = vmatprep.mubr.bf16.mxu0 %v1208_v8  ;;  %v1207_v43 = vpack.c.bf16 %v3254_v12, %v3202_v7  ;;  %v1209_v21 = vpack.c.bf16 %v3257_v52, %v3217_v20  ;;  %v728_v26 = vadd.f32 %v3206_v0, %v3023_v18 }
 0x1df   : > { %v2409_v2 = vpop.eup %2408  ;;  %v1088_v47 = vadd.f32 1.0, %v2403_v51  ;;  %v3368_v42 = vmul.f32 0.5, %v835_v57  ;;  %2420 = verf.f32 %v970_v36  ;;  %1632 = vmatprep.mubr.bf16.mxu1 %v1210_v38  ;;  %v971_v60 = vmul.f32 0.70710677, %v726_v48 }
 0x1e0   : > { %v1090_v13 = vadd.f32 1.0, %v2405_v35  ;;  %v3370_v63 = vmul.f32 0.5, %v724_v44  ;;  %v973_v62 = vmul.f32 0.70710677, %v839_v53  ;;  %1536 = vmatmul.mubr.bf16.gmra.mrb[40].mxu0 %v1207_v43  ;;  %1633 = vmatmul.mubr.bf16.gmra.mrb[40].mxu1 %v1209_v21  ;;  %v972_v7 = vmul.f32 0.70710677, %v728_v26 }
 0x1e1   : > { %v3373_v12 = vmul.f32 %v1089_v33, %v3277_v6  ;;  %2422 = verf.f32 %v971_v60  ;;  %v841_v0 = vadd.f32 %v3214_v39, %v3025_v19  ;;  %v732_v20 = vadd.f32 %v3230_v3, %v3019_v16 }
 0x1e2   : > { %v2411_v52 = vpop.eup %2410  ;;  %v1091_v57 = vadd.f32 1.0, %v2407_v29  ;;  %v1093_v1 = vadd.f32 1.0, %v2409_v2  ;;  %2424 = verf.f32 %v973_v62  ;;  %v845_v44 = vadd.f32 %v3232_v31, %v3021_v17  ;;  %v3638_v2 = vld [vmem:[#allocation18_spill] sm:$0xff]  ;;  %v3639_v62 = vld [vmem:[#allocation19_spill] sm:$0xff] }
 0x1e3   : > { %v3381_v45 = vmul.f32 0.5, %v837_v50  ;;  %2426 = verf.f32 %v972_v7  ;;  %v974_v37 = vmul.f32 0.70710677, %v841_v0  ;;  %v734_v6 = vadd.f32 %v3238_v32, %v3023_v18 }
 0x1e4   : > { %v2413_v55 = vpop.eup %2412  ;;  %v3386_v39 = vmul.f32 %v1088_v47, %v3283_v4  ;;  %v3389_v3 = vmul.f32 %v1090_v13, %v3294_v58  ;;  %v3391_v51 = vmul.f32 0.5, %v726_v48  ;;  %v975_v33 = vmul.f32 0.70710677, %v732_v20 }
 0x1e5   : > { %v1092_v36 = vadd.f32 1.0, %v2411_v52  ;;  %v3393_v8 = vmul.f32 0.5, %v839_v53  ;;  %2428 = verf.f32 %v974_v37  ;;  %v977_v31 = vmul.f32 0.70710677, %v845_v44  ;;  %v3640_v52 = vld [vmem:[#allocation20_spill] sm:$0xff] }
 0x1e6   : > { %v2415_v50 = vpop.eup %2414  ;;  %v3396_v35 = vmul.f32 %v1091_v57, %v3323_v24  ;;  %v3398_v32 = vmul.f32 %v1093_v1, %v901_v23  ;;  %v3400_v38 = vmul.f32 0.5, %v728_v26  ;;  %2430 = verf.f32 %v975_v33 }
 0x1e7   : > { %v2417_v4 = vpop.eup %2416  ;;  %v1094_v58 = vadd.f32 1.0, %v2413_v55  ;;  %v3402_v29 = vmul.f32 0.5, %v841_v0  ;;  %v3404_v48 = vmul.f32 0.5, %v732_v20  ;;  %v976_v43 = vmul.f32 0.70710677, %v734_v6 }
 0x1e8   : > { %v2419_v53 = vpop.eup %2418  ;;  %v3406_v21 = vmul.f32 0.5, %v845_v44  ;;  %v847_v47 = vadd.f32 %v3638_v2, %v3025_v19  ;;  %v1212_v24 = vpack.c.bf16 %v3340_v22, %v3314_v61  ;;  %v1214_v23 = vpack.c.bf16 %v3345_v46, %v3321_v27 }
 0x1e9   : > { %v2421_v26 = vpop.eup %2420  ;;  %v3415_v60 = vmul.f32 %v1092_v36, %v3342_v9  ;;  %v1095_v13 = vadd.f32 1.0, %v2415_v50  ;;  %2432 = verf.f32 %v977_v31  ;;  %v736_v7 = vadd.f32 %v3639_v62, %v3019_v16 }
 0x1ea   : > { %v1097_v0 = vadd.f32 1.0, %v2417_v4  ;;  %v978_v20 = vmul.f32 0.70710677, %v847_v47  ;;  %1543 = vmatprep.mubr.bf16.mxu0 %v1212_v24  ;;  %1640 = vmatprep.mubr.bf16.mxu1 %v1214_v23  ;;  %v849_v57 = vadd.f32 %v3640_v52, %v3021_v17  ;;  %v1211_v61 = vpack.c.bf16 %v3334_v5, %v3290_v30  ;;  %v3641_v5 = vld [vmem:[#allocation21_spill] sm:$0xff] }
 0x1eb   : > { %v2423_v27 = vpop.eup %2422  ;;  %v1096_v22 = vadd.f32 1.0, %v2419_v53  ;;  %2434 = verf.f32 %v976_v43  ;;  %v979_v9 = vmul.f32 0.70710677, %v736_v7  ;;  %v1213_v46 = vpack.c.bf16 %v3337_v59, %v3303_v11 }
 0x1ec   : > { %v2425_v1 = vpop.eup %2424  ;;  %v1158_v44 = vmul.f32 %v1094_v58, %v3350_v49  ;;  %v1098_v37 = vadd.f32 1.0, %v2421_v26  ;;  %2436 = verf.f32 %v978_v20  ;;  %v981_v55 = vmul.f32 0.70710677, %v849_v57  ;;  %1544 = vmatmul.mubr.bf16.gmra.mrb[44].mxu0 %v1211_v61 }
 0x1ed   : > { %v2427_v33 = vpop.eup %2426  ;;  %v3426_v36 = vmul.f32 0.5, %v734_v6  ;;  %2438 = verf.f32 %v979_v9  ;;  %1641 = vmatmul.mubr.bf16.gmra.mrb[44].mxu1 %v1213_v46  ;;  %v738_v30 = vadd.f32 %v3263_v25, %v3023_v18  ;;  %v851_v31 = vadd.f32 %v3641_v5, %v3025_v19 }
 0x1ee   : > { %v3433_v11 = vmul.f32 %v1095_v13, %v3352_v14  ;;  %v3436_v59 = vmul.f32 %v1097_v0, %v3368_v42  ;;  %2440 = verf.f32 %v981_v55  ;;  %v3440_v49 = vadd.f32 %v3292_v10, %v3019_v16 }
 0x1ef   : > { %v2429_v6 = vpop.eup %2428  ;;  %v3443_v50 = vmul.f32 %v1096_v22, %v3370_v63  ;;  %v1099_v4 = vadd.f32 1.0, %v2423_v27  ;;  %v1101_v25 = vadd.f32 1.0, %v2425_v1  ;;  %v980_v58 = vmul.f32 0.70710677, %v738_v30 }
 0x1f0   : > { %v2431_v43 = vpop.eup %2430  ;;  %v3446_v53 = vmul.f32 %v1098_v37, %v3381_v45  ;;  %v1100_v14 = vadd.f32 1.0, %v2427_v33  ;;  %v3448_v2 = vmul.f32 0.5, %v847_v47  ;;  %v982_v42 = vmul.f32 0.70710677, %v851_v31 }
 0x1f1   : > { %v1102_v24 = vadd.f32 1.0, %v2429_v6  ;;  %v915_v23 = vmul.f32 0.5, %v736_v7  ;;  %2442 = verf.f32 %v980_v58  ;;  %v3452_v10 = vadd.f32 %v3298_v41, %v3021_v17 }
 0x1f2   : > { %v917_v63 = vmul.f32 0.5, %v849_v57  ;;  %2444 = verf.f32 %v982_v42  ;;  %v983_v26 = vmul.f32 0.70710677, %v3440_v49  ;;  %v3457_v13 = vadd.f32 %v3300_v15, %v3023_v18 }
 0x1f3   : > { %v2433_v45 = vpop.eup %2432  ;;  %v3460_v47 = vmul.f32 %v1099_v4, %v3391_v51  ;;  %v3463_v62 = vmul.f32 %v1101_v25, %v3393_v8  ;;  %v1103_v7 = vadd.f32 1.0, %v2431_v43  ;;  %v985_v0 = vmul.f32 0.70710677, %v3452_v10 }
 0x1f4   : > { %v1164_v41 = vmul.f32 %v1100_v14, %v3400_v38  ;;  %v916_v20 = vmul.f32 0.5, %v738_v30  ;;  %v918_v52 = vmul.f32 0.5, %v851_v31  ;;  %v984_v57 = vmul.f32 0.70710677, %v3457_v13  ;;  %v3642_v38 = vld [vmem:[#allocation22_spill] sm:$0xff] }
 0x1f5   : > { %v2435_v61 = vpop.eup %2434  ;;  %v1166_v15 = vmul.f32 %v1102_v24, %v3402_v29  ;;  %v3471_v27 = vadd.f32 %v3309_v54, %v3025_v19  ;;  %v1216_v51 = vpack.c.bf16 %v3415_v60, %v3386_v39  ;;  %v1218_v8 = vpack.c.bf16 %v1158_v44, %v3389_v3 }
 0x1f6   : > { %v2437_v22 = vpop.eup %2436  ;;  %v1105_v9 = vadd.f32 1.0, %v2433_v45  ;;  %2446 = verf.f32 %v983_v26  ;;  %v746_v46 = vadd.f32 %v3642_v38, %v3019_v16  ;;  %v3480_v1 = vadd.f32 %v3316_v56, %v3021_v17 }
 0x1f7   : > { %v2439_v29 = vpop.eup %2438  ;;  %v3483_v37 = vmul.f32 %v1103_v7, %v3404_v48  ;;  %2448 = verf.f32 %v985_v0  ;;  %v986_v54 = vmul.f32 0.70710677, %v3471_v27  ;;  %1551 = vmatprep.mubr.bf16.mxu0 %v1216_v51  ;;  %1648 = vmatprep.mubr.bf16.mxu1 %v1218_v8  ;;  %v1215_v39 = vpack.c.bf16 %v3396_v35, %v3348_v34 }
 0x1f8   : > { %v2441_v3 = vpop.eup %2440  ;;  %v1104_v60 = vadd.f32 1.0, %v2435_v61  ;;  %v1107_v44 = vadd.f32 1.0, %v2439_v29  ;;  %2450 = verf.f32 %v984_v57  ;;  %v987_v16 = vmul.f32 0.70710677, %v746_v46 }
 0x1f9   : > { %v1106_v55 = vadd.f32 1.0, %v2437_v22  ;;  %v1109_v17 = vadd.f32 1.0, %v2441_v3  ;;  %2452 = verf.f32 %v986_v54  ;;  %v989_v56 = vmul.f32 0.70710677, %v3480_v1  ;;  %1552 = vmatmul.mubr.bf16.gmra.mrb[48].mxu0 %v1215_v39 }
 0x1fa   : > { %v1171_v48 = vmul.f32 %v1107_v44, %v915_v23  ;;  %2454 = verf.f32 %v987_v16  ;;  %v1217_v33 = vpack.c.bf16 %v3398_v32, %v3373_v12  ;;  %v748_v30 = vadd.f32 %v3318_v40, %v3023_v18 }
 0x1fb   : > { %v2443_v34 = vpop.eup %2442  ;;  %v3493_v35 = vmul.f32 %v1109_v17, %v917_v63  ;;  %2456 = verf.f32 %v989_v56  ;;  %v861_v5 = vadd.f32 %v3327_v28, %v3025_v19  ;;  %v1220_v31 = vpack.c.bf16 %v1164_v41, %v3443_v50 }
 0x1fc   : > { %v2445_v6 = vpop.eup %2444  ;;  %v1169_v4 = vmul.f32 %v1105_v9, %v3406_v21  ;;  %v1108_v25 = vadd.f32 1.0, %v2443_v34  ;;  %1649 = vmatmul.mubr.bf16.gmra.mrb[48].mxu1 %v1217_v33  ;;  %v988_v58 = vmul.f32 0.70710677, %v748_v30  ;;  %v1222_v12 = vpack.c.bf16 %v1166_v15, %v3446_v53 }
 0x1fd   : > { %v1168_v32 = vmul.f32 %v1104_v60, %v3426_v36  ;;  %v1110_v18 = vadd.f32 1.0, %v2445_v6  ;;  %v990_v40 = vmul.f32 0.70710677, %v861_v5  ;;  %1559 = vmatprep.mubr.bf16.mxu0 %v1220_v31  ;;  %v1219_v43 = vpack.c.bf16 %v3460_v47, %v3433_v11 }
 0x1fe   : > { %v1170_v19 = vmul.f32 %v1106_v55, %v3448_v2  ;;  %v1172_v28 = vmul.f32 %v1108_v25, %v916_v20  ;;  %2458 = verf.f32 %v988_v58  ;;  %1656 = vmatprep.mubr.bf16.mxu1 %v1222_v12  ;;  %v1221_v21 = vpack.c.bf16 %v3463_v62, %v3436_v59 }
 0x1ff   : > { %v1174_v50 = vmul.f32 %v1110_v18, %v918_v52  ;;  %2460 = verf.f32 %v990_v40  ;;  %v1223_v53 = vpack.c.bf16 %v1171_v48, %v3483_v37  ;;  %v1225_v36 = vpack.c.bf16 %v3493_v35, %v1169_v4  ;;  %v3514_v35 = vld [vmem:[#allocation11] ss:$0 sm:$0xff] }
 0x200   : > { %v2447_v14 = vpop.eup %2446  ;;  %v1224_v42 = vpack.c.bf16 %v1172_v28, %v1168_v32  ;;  %v919_v59 = vmul.f32 0.5, %v3440_v49  ;;  %v923_v62 = vmul.f32 0.5, %v746_v46  ;;  %v921_v0 = vmul.f32 0.5, %v3452_v10 }
 0x201   : > { %v2449_v24 = vpop.eup %2448  ;;  %1560 = vmatmul.mubr.bf16.gmra.mrb[52].mxu0 %v1219_v43  ;;  %v1226_v23 = vpack.c.bf16 %v1174_v50, %v1170_v19  ;;  %v1111_v63 = vadd.f32 1.0, %v2447_v14  ;;  %v925_v41 = vmul.f32 0.5, %v3480_v1  ;;  %v920_v38 = vmul.f32 0.5, %v3457_v13 }
 0x202   : > { %v2451_v11 = vpop.eup %2450  ;;  %1567 = vmatprep.mubr.bf16.mxu0 %v1224_v42  ;;  %v1113_v45 = vadd.f32 1.0, %v2449_v24  ;;  %v924_v29 = vmul.f32 0.5, %v748_v30  ;;  %v922_v37 = vmul.f32 0.5, %v3471_v27  ;;  %v926_v10 = vmul.f32 0.5, %v861_v5 }
 0x203   : > { %v2453_v2 = vpop.eup %2452  ;;  %v1175_v52 = vmul.f32 %v1111_v63, %v919_v59  ;;  %v1112_v57 = vadd.f32 1.0, %v2451_v11 }
 0x204   : > { %v2455_v26 = vpop.eup %2454  ;;  %1657 = vmatmul.mubr.bf16.gmra.mrb[52].mxu1 %v1221_v21  ;;  %v1177_v51 = vmul.f32 %v1113_v45, %v921_v0  ;;  %v1114_v8 = vadd.f32 1.0, %v2453_v2 }
 0x205   : > { %v2457_v47 = vpop.eup %2456  ;;  %v1115_v7 = vadd.f32 1.0, %v2455_v26  ;;  %1664 = vmatprep.mubr.bf16.mxu1 %v1226_v23  ;;  %v1176_v39 = vmul.f32 %v1112_v57, %v920_v38 }
 0x206   : > { %v1117_v20 = vadd.f32 1.0, %v2457_v47  ;;  %v1178_v60 = vmul.f32 %v1114_v8, %v922_v37 }
 0x207   : > { %v1179_v61 = vmul.f32 %v1115_v7, %v923_v62 }
 0x208   : > { %v2459_v15 = vpop.eup %2458  ;;  %v1181_v22 = vmul.f32 %v1117_v20, %v925_v41 }
 0x209   : > { %v2461_v9 = vpop.eup %2460  ;;  %v1116_v49 = vadd.f32 1.0, %v2459_v15  ;;  %1568 = vmatmul.mubr.bf16.gmra.mrb[56].mxu0 %v1223_v53  ;;  %v1227_v46 = vpack.c.bf16 %v1179_v61, %v1175_v52 }
 0x20a   : > { %v1118_v54 = vadd.f32 1.0, %v2461_v9  ;;  %v1229_v1 = vpack.c.bf16 %v1181_v22, %v1177_v51 }
 0x20b   : > { %v1180_v3 = vmul.f32 %v1116_v49, %v924_v29 }
 0x20c   : > { %v1182_v44 = vmul.f32 %v1118_v54, %v926_v10  ;;  %1665 = vmatmul.mubr.bf16.gmra.mrb[56].mxu1 %v1225_v36 }
 0x20d   : > { %v1228_v16 = vpack.c.bf16 %v1180_v3, %v1176_v39 }
 0x20e   : > { %v1230_v55 = vpack.c.bf16 %v1182_v44, %v1178_v60 }
 0x20f   : > { %1575 = vmatprep.mubr.bf16.mxu0 %v1228_v16 }
 0x210   : > { %1672 = vmatprep.mubr.bf16.mxu1 %v1230_v55 }
 0x211   : > { %1576 = vmatmul.mubr.bf16.gmra.mrb[60].mxu0 %v1227_v46 }
 0x214   : > { %1673 = vmatmul.mubr.bf16.gmra.mrb[60].mxu1 %v1229_v1 }
 0x295   : > { %v2024_v13 = vpop.f32.mrb[32].mxu0  ;;  %v2088_v17 = vpop.f32.mrb[32].mxu1 }
 0x296   : > { %v2025_v56 = vpop.f32.mrb[33].mxu0  ;;  %v2089_v48 = vpop.f32.mrb[33].mxu1 }
 0x297   : > { %v2026_v27 = vadd.f32 %v2025_v56, %v2024_v13  ;;  %v2090_v33 = vadd.f32 %v2089_v48, %v2088_v17  ;;  %v2027_v30 = vpop.f32.mrb[34].mxu0  ;;  %v2091_v34 = vpop.f32.mrb[34].mxu1 }
 0x298   : > { %v2028_v5 = vpop.f32.mrb[35].mxu0  ;;  %v2092_v31 = vpop.f32.mrb[35].mxu1 }
 0x299   : > { %v1619_v6 = vadd.f32 %v2090_v33, %v2026_v27  ;;  %v2029_v4 = vadd.f32 %v2028_v5, %v2027_v30  ;;  %v2093_v25 = vadd.f32 %v2092_v31, %v2091_v34 }
 0x29b   : > { %v1739_v58 = vadd.f32 %v3514_v35, %v1619_v6  ;;  %v1622_v12 = vadd.f32 %v2093_v25, %v2029_v4 }
 0x29d   : > { %1755 = vst [vmem:[%s3517_s28] sm:$0xff] %v1739_v58  ;;  %v1740_v32 = vadd.f32 %v3514_v35, %v1622_v12 }
 0x29f   : > { %1756 = vst [vmem:[%s3517_s28 + $0x8] sm:$0xff] %v1740_v32 }
 0x2a4   : > { %v2030_v18 = vpop.f32.mrb[36].mxu0 }
 0x2a5   : > { %v2094_v40 = vpop.f32.mrb[36].mxu1  ;;  %v2031_v43 = vpop.f32.mrb[37].mxu0 }
 0x2a6   : > { %v2095_v19 = vpop.f32.mrb[37].mxu1  ;;  %v2032_v28 = vadd.f32 %v2031_v43, %v2030_v18  ;;  %v2033_v50 = vpop.f32.mrb[38].mxu0 }
 0x2a7   : > { %v2096_v21 = vadd.f32 %v2095_v19, %v2094_v40  ;;  %v2097_v53 = vpop.f32.mrb[38].mxu1  ;;  %v2034_v36 = vpop.f32.mrb[39].mxu0 }
 0x2a8   : > { %v2098_v14 = vpop.f32.mrb[39].mxu1  ;;  %v2035_v24 = vadd.f32 %v2034_v36, %v2033_v50 }
 0x2a9   : > { %v1627_v42 = vadd.f32 %v2096_v21, %v2032_v28  ;;  %v2099_v23 = vadd.f32 %v2098_v14, %v2097_v53 }
 0x2ab   : > { %v1741_v11 = vadd.f32 %v3514_v35, %v1627_v42  ;;  %v1630_v2 = vadd.f32 %v2099_v23, %v2035_v24 }
 0x2ad   : > { %1757 = vst [vmem:[%s3517_s28 + $0x10] sm:$0xff] %v1741_v11  ;;  %v1742_v63 = vadd.f32 %v3514_v35, %v1630_v2 }
 0x2af   : > { %1758 = vst [vmem:[%s3517_s28 + $0x18] sm:$0xff] %v1742_v63 }
 0x2b3   : > { %v2036_v26 = vpop.f32.mrb[40].mxu0  ;;  %v2100_v45 = vpop.f32.mrb[40].mxu1 }
 0x2b4   : > { %v2037_v47 = vpop.f32.mrb[41].mxu0  ;;  %v2101_v59 = vpop.f32.mrb[41].mxu1 }
 0x2b5   : > { %v2038_v62 = vadd.f32 %v2037_v47, %v2036_v26  ;;  %v2102_v7 = vadd.f32 %v2101_v59, %v2100_v45  ;;  %v2039_v0 = vpop.f32.mrb[42].mxu0  ;;  %v2103_v41 = vpop.f32.mrb[42].mxu1 }
 0x2b6   : > { %v2040_v20 = vpop.f32.mrb[43].mxu0  ;;  %v2104_v52 = vpop.f32.mrb[43].mxu1 }
 0x2b7   : > { %v1635_v57 = vadd.f32 %v2102_v7, %v2038_v62  ;;  %v2041_v61 = vadd.f32 %v2040_v20, %v2039_v0  ;;  %v2105_v15 = vadd.f32 %v2104_v52, %v2103_v41 }
 0x2b9   : > { %v1743_v51 = vadd.f32 %v3514_v35, %v1635_v57  ;;  %v1638_v8 = vadd.f32 %v2105_v15, %v2041_v61 }
 0x2bb   : > { %1759 = vst [vmem:[%s3517_s28 + $0x20] sm:$0xff] %v1743_v51  ;;  %v1744_v22 = vadd.f32 %v3514_v35, %v1638_v8 }
 0x2bd   : > { %1760 = vst [vmem:[%s3517_s28 + $0x28] sm:$0xff] %v1744_v22 }
 0x2bf   : > { %v2042_v9 = vpop.f32.mrb[44].mxu0 }
 0x2c0   : > { %v2106_v38 = vpop.f32.mrb[44].mxu1  ;;  %v2043_v29 = vpop.f32.mrb[45].mxu0 }
 0x2c1   : > { %v2044_v49 = vadd.f32 %v2043_v29, %v2042_v9  ;;  %v2107_v46 = vpop.f32.mrb[45].mxu1  ;;  %v2045_v37 = vpop.f32.mrb[46].mxu0 }
 0x2c2   : > { %v2108_v10 = vadd.f32 %v2107_v46, %v2106_v38  ;;  %v2109_v54 = vpop.f32.mrb[46].mxu1  ;;  %v2046_v1 = vpop.f32.mrb[47].mxu0 }
 0x2c3   : > { %v2047_v39 = vadd.f32 %v2046_v1, %v2045_v37  ;;  %v2110_v3 = vpop.f32.mrb[47].mxu1 }
 0x2c4   : > { %v1643_v60 = vadd.f32 %v2108_v10, %v2044_v49  ;;  %v2111_v44 = vadd.f32 %v2110_v3, %v2109_v54 }
 0x2c6   : > { %v1745_v16 = vadd.f32 %v3514_v35, %v1643_v60  ;;  %v1646_v55 = vadd.f32 %v2111_v44, %v2047_v39 }
 0x2c8   : > { %1761 = vst [vmem:[%s3517_s28 + $0x30] sm:$0xff] %v1745_v16  ;;  %v1746_v13 = vadd.f32 %v3514_v35, %v1646_v55 }
 0x2ca   : > { %1762 = vst [vmem:[%s3517_s28 + $0x38] sm:$0xff] %v1746_v13 }
 0x2cc   : > { %v2048_v17 = vpop.f32.mrb[48].mxu0 }
 0x2cd   : > { %v2049_v56 = vpop.f32.mrb[49].mxu0 }
 0x2ce   : > { %v2050_v48 = vadd.f32 %v2049_v56, %v2048_v17  ;;  %v2051_v27 = vpop.f32.mrb[50].mxu0 }
 0x2cf   : > { %v2112_v33 = vpop.f32.mrb[48].mxu1  ;;  %v2052_v30 = vpop.f32.mrb[51].mxu0 }
 0x2d0   : > { %v2113_v34 = vpop.f32.mrb[49].mxu1  ;;  %v2053_v5 = vadd.f32 %v2052_v30, %v2051_v27 }
 0x2d1   : > { %v2114_v31 = vadd.f32 %v2113_v34, %v2112_v33  ;;  %v2115_v6 = vpop.f32.mrb[50].mxu1 }
 0x2d2   : > { %v2116_v4 = vpop.f32.mrb[51].mxu1 }
 0x2d3   : > { %v1651_v25 = vadd.f32 %v2114_v31, %v2050_v48  ;;  %v2117_v58 = vadd.f32 %v2116_v4, %v2115_v6 }
 0x2d4   : > { %v2054_v12 = vpop.f32.mrb[52].mxu0 }
 0x2d5   : > { %v1747_v32 = vadd.f32 %v3514_v35, %v1651_v25  ;;  %v1654_v18 = vadd.f32 %v2117_v58, %v2053_v5  ;;  %v2055_v40 = vpop.f32.mrb[53].mxu0 }
 0x2d6   : > { %v2056_v43 = vadd.f32 %v2055_v40, %v2054_v12  ;;  %v2057_v19 = vpop.f32.mrb[54].mxu0 }
 0x2d7   : > { %1763 = vst [vmem:[%s3517_s28 + $0x40] sm:$0xff] %v1747_v32  ;;  %v1748_v28 = vadd.f32 %v3514_v35, %v1654_v18  ;;  %v2118_v21 = vpop.f32.mrb[52].mxu1  ;;  %v2058_v50 = vpop.f32.mrb[55].mxu0 }
 0x2d8   : > { %v2119_v53 = vpop.f32.mrb[53].mxu1  ;;  %v2059_v36 = vadd.f32 %v2058_v50, %v2057_v19 }
 0x2d9   : > { %1764 = vst [vmem:[%s3517_s28 + $0x48] sm:$0xff] %v1748_v28  ;;  %v2120_v14 = vadd.f32 %v2119_v53, %v2118_v21  ;;  %v2121_v42 = vpop.f32.mrb[54].mxu1 }
 0x2da   : > { %v2122_v24 = vpop.f32.mrb[55].mxu1 }
 0x2db   : > { %v1659_v23 = vadd.f32 %v2120_v14, %v2056_v43  ;;  %v2123_v11 = vadd.f32 %v2122_v24, %v2121_v42 }
 0x2dc   : > { %v2060_v2 = vpop.f32.mrb[56].mxu0 }
 0x2dd   : > { %v1749_v63 = vadd.f32 %v3514_v35, %v1659_v23  ;;  %v1662_v26 = vadd.f32 %v2123_v11, %v2059_v36  ;;  %v2061_v45 = vpop.f32.mrb[57].mxu0 }
 0x2de   : > { %v2062_v47 = vadd.f32 %v2061_v45, %v2060_v2  ;;  %v2063_v59 = vpop.f32.mrb[58].mxu0 }
 0x2df   : > { %1765 = vst [vmem:[%s3517_s28 + $0x50] sm:$0xff] %v1749_v63  ;;  %v1750_v62 = vadd.f32 %v3514_v35, %v1662_v26  ;;  %v2124_v7 = vpop.f32.mrb[56].mxu1  ;;  %v2064_v0 = vpop.f32.mrb[59].mxu0 }
 0x2e0   : > { %v2125_v41 = vpop.f32.mrb[57].mxu1  ;;  %v2065_v20 = vadd.f32 %v2064_v0, %v2063_v59 }
 0x2e1   : > { %1766 = vst [vmem:[%s3517_s28 + $0x58] sm:$0xff] %v1750_v62  ;;  %v2126_v52 = vadd.f32 %v2125_v41, %v2124_v7  ;;  %v2127_v57 = vpop.f32.mrb[58].mxu1 }
 0x2e2   : > { %v2128_v61 = vpop.f32.mrb[59].mxu1 }
 0x2e3   : > { %v1667_v15 = vadd.f32 %v2126_v52, %v2062_v47  ;;  %v2129_v51 = vadd.f32 %v2128_v61, %v2127_v57 }
 0x2e4   : > { %v2066_v8 = vpop.f32.mrb[60].mxu0 }
 0x2e5   : > { %v1751_v22 = vadd.f32 %v3514_v35, %v1667_v15  ;;  %v1670_v9 = vadd.f32 %v2129_v51, %v2065_v20  ;;  %v2067_v38 = vpop.f32.mrb[61].mxu0 }
 0x2e6   : > { %v2068_v29 = vadd.f32 %v2067_v38, %v2066_v8  ;;  %v2069_v49 = vpop.f32.mrb[62].mxu0 }
 0x2e7   : > { %1767 = vst [vmem:[%s3517_s28 + $0x60] sm:$0xff] %v1751_v22  ;;  %v1752_v46 = vadd.f32 %v3514_v35, %v1670_v9  ;;  %v2130_v37 = vpop.f32.mrb[60].mxu1  ;;  %v2070_v10 = vpop.f32.mrb[63].mxu0 }
 0x2e8   : > { %v2131_v54 = vpop.f32.mrb[61].mxu1  ;;  %v2071_v1 = vadd.f32 %v2070_v10, %v2069_v49 }
 0x2e9   : > { %1768 = vst [vmem:[%s3517_s28 + $0x68] sm:$0xff] %v1752_v46  ;;  %v2132_v39 = vadd.f32 %v2131_v54, %v2130_v37  ;;  %v2133_v3 = vpop.f32.mrb[62].mxu1 }
 0x2ea   : > { %v2134_v60 = vpop.f32.mrb[63].mxu1 }
 0x2eb   : > { %v1675_v44 = vadd.f32 %v2132_v39, %v2068_v29  ;;  %v2135_v16 = vadd.f32 %v2134_v60, %v2133_v3 }
 0x2ed   : > { %v1753_v55 = vadd.f32 %v3514_v35, %v1675_v44  ;;  %v1678_v13 = vadd.f32 %v2135_v16, %v2071_v1 }
 0x2ef   : > { %1769 = vst [vmem:[%s3517_s28 + $0x70] sm:$0xff] %v1753_v55  ;;  %v1754_v17 = vadd.f32 %v3514_v35, %v1678_v13 }
 0x2f1   : > { %1770 = vst [vmem:[%s3517_s28 + $0x78] sm:$0xff] %v1754_v17 }
 0x2f2   : > { %2617 = shalt.err (!%p2614_p0)
}
 0x2f3   : > { %s2618_s17 = scalar_lea.hbm %s3552_s11, 2048  ;;  %s2622_s9 = scalar_lea.hbm %s3611_s5, 4096 }
 0x2f4   : > { %p2619_p4 = scmp.ne.s32.totalorder %s3552_s11, %s2618_s17  ;;  %p2623_p12 = scmp.lt.u32.totalorder %s3552_s11, %s3611_s5 }
 0x2f5   : > { %p2624_p1 = scmp.lt.u32.totalorder %s2622_s9, %s2618_s17  ;;  %p2626_p10 = scmp.lt.u32.totalorder %s2618_s17, %s3552_s11 }
 0x2f6   : > { %p2620_p13 = pnand %p2619_p4, %p2919_p5 }
 0x2f7   : > { %p2625_p11 = por %p2624_p1, %p2623_p12 }
 0x2f8   : > { %p2621_p6 = pneg %p2620_p13 }
 0x2f9   : > { %p2627_p3 = por %p2626_p10, %p2625_p11 }
 0x2fb   : > { %p2628_p2 = pnand %p2627_p3, %p2621_p6 }
 0x2fd   : > { %2631 = shalt.err (!%p2628_p2)
}
 0x2fe   : > { %s2707_s28 = smov 128   ;;  %s2708_s30 = smov 8  }
 0x2ff   : > { %2154 = dma.vmem_to_hbm [thread:$0]  (%p2919_p5), %s3554_s6, 2048, %s3552_s11, %s1772_s1, %s2707_s28, %s2707_s28, %s2708_s30  }
 0x300 PF: > { %s3643_s29 = sld [smem:[#allocation17_spill]]  ;;  %s1800_s13 = sand.u32 1, %s2674_s18  }
 0x301   : > { %p3645_p7 = scmp.ge.s32.totalorder %s2694_s23, 2  ;;  %s1801_s21 = scalar_lea.sflag [#allocation5], %s1800_s13 }
 0x306   : > { %p3644_p8 = scmp.ne.s32.totalorder %s3643_s29, 0 }
 0x308   : > { %p2174_p9 = pnand %p3645_p7, %p3644_p8 }
 0x30a   : > { %2669 = dma.done.wait (!%p2174_p9), %s1801_s21, 2048  }
 0x30b   : > { %2671 = vsyncadd (!%p2174_p9), %s1801_s21, 4294965248  ;;  %s23_s23 = sadd.s32 1, %s2694_s23   ;;  %s3646_s18 = smov %s2678_s19 }
 0x30c   : > { %p20_p0 = scmp.ge.s32.totalorder %s23_s23, 4   ;;  %s3647_s19 = smov %s2682_s20 }
 0x30d   : > { %s3648_s20 = smov %s2928_s7  ;;  %s3649_s21 = smov %s2690_s22 }
 0x30e   : > { %s3650_s22 = smov %s3652_s16  ;;  %22 = sbr.rel (!%p20_p0) target bundleno = 10 (0xa), region = 112 }
 0x315   :  { %1806 = vsyncpa [#allocation4], 1 }
 0x316   :  { %1808 = vsyncpa [#allocation4 + $0x1], 1 }
 0x317   :  { %1809 = vsyncpa [#allocation7], 1 }
 0x318   :  { %1810 = vsyncpa [#allocation10], 1 }
 0x319   :  { %1811 = vsyncpa [#allocation5], 1 }
 0x31a   :  { %1813 = vsyncpa [#allocation5 + $0x1], 1 }

</bundles_post_ra>
